<compile_context>
chip_gen: v5e
topology: v5e:2x2
jax: 0.10.0
libtpu: 0.0.40
codegen_flags: <defaults>
</compile_context>

<pallas_src>
import functools

import jax
import jax.numpy as jnp
from jax import lax
from jax.experimental import pallas as pl
from jax.experimental.pallas import tpu as pltpu

BN_EPS = 1e-5


def _conv_stats_kernel(x_ref, w_ref, valid_ref, y_ref, stats_ref, *, offsets):
    """Per-image implicit-GEMM convolution + per-channel sum / sum-of-squares.

    x_ref:     (1, Lf, Cin)   bf16  flattened padded image rows (or im2col patches, P=1).
    w_ref:     (P, Cin, OCp)  bf16  one (Cin, OCp) weight matrix per kernel tap (resident).
    valid_ref: (rows, 1)      f32   1.0 for real output rows, 0.0 for wrap-around junk rows.
    y_ref:     (1, rows, OCp) bf16  conv output staging (junk rows forced to 0).
    stats_ref: (1, 8, OCp)    f32   row 0 = sum(y), row 1 = sum(y^2) over this image.
    """
    rows, ocp = y_ref.shape[1], y_ref.shape[2]
    acc = jnp.zeros((rows, ocp), jnp.float32)
    for p, off in enumerate(offsets):          # unrolled: KH*KW taps (or a single im2col tap)
        acc = acc + jnp.dot(x_ref[0, pl.ds(off, rows), :], w_ref[p],
                            preferred_element_type=jnp.float32)
    acc = acc * valid_ref[...]                 # zero the wrap-around junk rows (stats + y)
    # Stats taken from the f32 accumulator BEFORE the bf16 cast (exact-to-f32).
    stats_ref[0, 0:1, :] = jnp.sum(acc, axis=0, keepdims=True)
    stats_ref[0, 1:2, :] = jnp.sum(acc * acc, axis=0, keepdims=True)
    y_ref[0] = acc.astype(y_ref.dtype)


def _bn_apply_kernel(y_ref, scale_ref, shift_ref, o_ref):
    # Pure lane-dense FMA; all per-channel mean/var/rsqrt math was hoisted to the wrapper.
    o_ref[0] = (y_ref[0].astype(jnp.float32) * scale_ref[...]
                + shift_ref[...]).astype(o_ref.dtype)


def conv_bn_forward(x_nchw, weight, bias, gamma, beta, *, stride=1, padding=0):
    """x_nchw: [N, C, H, W]; weight: [OC, C, KH, KW] (PyTorch layouts). Returns NCHW f32."""
    del bias  # Exactly cancelled by the BatchNorm mean subtraction -> free to drop.

    N, C, H, W = x_nchw.shape
    OC, _, KH, KW = weight.shape

    # NCHW -> NHWC (+ spatial zero padding).
    x = jnp.transpose(x_nchw, (0, 2, 3, 1))
    if padding > 0:
        x = jnp.pad(x, ((0, 0), (padding, padding), (padding, padding), (0, 0)))
    Hp, Wp = H + 2 * padding, W + 2 * padding
    OH = (Hp - KH) // stride + 1
    OW = (Wp - KW) // stride + 1

    # Output-channel padding: 128 lanes (v5e MXU width); 256 on the 256-wide v6e/v7x MXUs
    # when OC > 128 (unless that would over-inflate the channel dim).
    if OC > 128:
        OCp = -(-OC // 256) * 256
        if OCp > 1.5 * OC:
            OCp = -(-OC // 128) * 128
    else:
        OCp = 128

    # Weight taps: [KH*KW, C, OC] with tap index p = kh*KW + kw.
    w_taps = jnp.transpose(weight, (2, 3, 1, 0)).reshape(KH * KW, C, OC)

    if stride == 1:
        # Fast path (no im2col): flatten each padded image to (Hp*Wp, C); tap (kh, kw) is a
        # shifted contiguous (rows, C) slice starting at kh*Wp + kw.  Rows are laid out on the
        # padded width Wp; columns [OW, Wp) are wrap-around junk (masked / sliced off later).
        rows = OH * Wp
        extra = KW - 1                                   # keep the last tap's slice in bounds
        x2d = x.reshape(N, Hp * Wp, C)
        if extra > 0:
            x2d = jnp.pad(x2d, ((0, 0), (0, extra), (0, 0)))
        Lf = Hp * Wp + extra
        offsets = tuple(kh * Wp + kw for kh in range(KH) for kw in range(KW))
        w3d = w_taps
        col = jnp.arange(rows, dtype=jnp.int32) % Wp
        valid = (col < OW).astype(jnp.float32).reshape(rows, 1)
    else:
        # TODO(synk): stride > 1 fallback uses wrapper-side im2col (KH*KW x read amplification).
        cols = []
        for kh in range(KH):
            for kw in range(KW):
                cols.append(x[:, kh:kh + (OH - 1) * stride + 1:stride,
                               kw:kw + (OW - 1) * stride + 1:stride, :])
        rows = OH * OW
        K = KH * KW * C
        x2d = jnp.concatenate(cols, axis=-1).reshape(N, rows, K)
        Lf = rows
        offsets = (0,)
        w3d = w_taps.reshape(1, K, OC)
        valid = jnp.ones((rows, 1), jnp.float32)

    x2d = x2d.astype(jnp.bfloat16)
    P, Cin = w3d.shape[0], w3d.shape[1]
    w3d = jnp.pad(w3d, ((0, 0), (0, 0), (0, OCp - OC))).astype(jnp.bfloat16)

    cparams = pltpu.CompilerParams(
        dimension_semantics=("parallel",),          # images are independent -> megacore-shardable
        vmem_limit_bytes=48 * 1024 * 1024)          # headroom under v7x's 64 MiB VMEM

    # -------- Pass 1: implicit-GEMM conv (MXU, f32 accumulation) + per-image sum / sumsq ----
    y, stats = pl.pallas_call(
        functools.partial(_conv_stats_kernel, offsets=offsets),
        out_shape=(jax.ShapeDtypeStruct((N, rows, OCp), jnp.bfloat16),
                   jax.ShapeDtypeStruct((N, 8, OCp), jnp.float32)),
        grid_spec=pltpu.PrefetchScalarGridSpec(
            num_scalar_prefetch=0,
            grid=(N,),
            in_specs=[pl.BlockSpec((1, Lf, Cin), lambda n: (n, 0, 0)),
                      pl.BlockSpec((P, Cin, OCp), lambda n: (0, 0, 0)),
                      pl.BlockSpec((rows, 1), lambda n: (0, 0))],
            out_specs=[pl.BlockSpec((1, rows, OCp), lambda n: (n, 0, 0)),
                       pl.BlockSpec((1, 8, OCp), lambda n: (n, 0, 0))]),
        compiler_params=cparams,
    )(x2d, w3d, valid)

    # -------- Tiny per-channel BN folding (hoisted out of the mem-bound pass 2) --------------
    # Divisor is the true element count; masked junk rows contribute exactly 0 to the sums.
    inv_count = 1.0 / float(N * OH * OW)
    s = jnp.sum(stats[:, 0, :], axis=0)
    sq = jnp.sum(stats[:, 1, :], axis=0)
    mean = s * inv_count
    var = sq * inv_count - mean * mean          # E[y^2]-E[y]^2; fine at f32 for this tolerance
    gamma_p = jnp.pad(gamma.astype(jnp.float32), (0, OCp - OC))   # zero pad: padded chans -> 0
    beta_p = jnp.pad(beta.astype(jnp.float32), (0, OCp - OC))
    scale_v = gamma_p * lax.rsqrt(var + BN_EPS)
    shift_v = beta_p - mean * scale_v
    scale_row = scale_v.reshape(1, OCp)
    shift_row = shift_v.reshape(1, OCp)

    # -------- Pass 2: lane-dense normalize y*scale + shift ----------------------------------
    out_flat = pl.pallas_call(
        _bn_apply_kernel,
        out_shape=jax.ShapeDtypeStruct((N, rows, OCp), jnp.float32),
        grid_spec=pltpu.PrefetchScalarGridSpec(
            num_scalar_prefetch=0,
            grid=(N,),
            in_specs=[pl.BlockSpec((1, rows, OCp), lambda n: (n, 0, 0)),
                      pl.BlockSpec((1, OCp), lambda n: (0, 0)),
                      pl.BlockSpec((1, OCp), lambda n: (0, 0))],
            out_specs=pl.BlockSpec((1, rows, OCp), lambda n: (n, 0, 0))),
        compiler_params=cparams,
    )(y, scale_row, shift_row)

    # Strip channel / width padding, back to NCHW (PyTorch layout parity).
    if stride == 1:
        out = out_flat[:, :, :OC].reshape(N, OH, Wp, OC)[:, :, :OW, :]
    else:
        out = out_flat[:, :, :OC].reshape(N, OH, OW, OC)
    return jnp.transpose(out, (0, 3, 1, 2))


def _reference(x_nchw, weight, bias, gamma, beta, *, stride=1, padding=0):
    # Same precision contract as the kernel's inputs: bf16-quantized conv operands, f32 math.
    xq = x_nchw.astype(jnp.bfloat16).astype(jnp.float32)
    wq = weight.astype(jnp.bfloat16).astype(jnp.float32)
    y = lax.conv_general_dilated(
        xq, wq,
        window_strides=(stride, stride),
        padding=[(padding, padding), (padding, padding)],
        dimension_numbers=("NCHW", "OIHW", "NCHW"),
        precision=lax.Precision.HIGHEST,
    ) + bias.reshape(1, -1, 1, 1)
    mean = jnp.mean(y, axis=(0, 2, 3), keepdims=True)
    var = jnp.mean((y - mean) ** 2, axis=(0, 2, 3), keepdims=True)
    y_hat = (y - mean) * lax.rsqrt(var + BN_EPS)
    return y_hat * gamma.reshape(1, -1, 1, 1) + beta.reshape(1, -1, 1, 1)


if __name__ == "__main__":
    key = jax.random.PRNGKey(0)
    k_x, k_w, k_b = jax.random.split(key, 3)

    # Small shapes consistent with the module: N=2, C_in=4, H=W=16, C_out=8, k=3, s=1, p=0.
    N, C_in, H, W = 2, 4, 16, 16
    C_out, KH, KW = 8, 3, 3

    x = jax.random.normal(k_x, (N, C_in, H, W), dtype=jnp.float32)

    # Deterministic parameter init (PyTorch-like fan-in scaling for conv; BN defaults).
    fan_in = C_in * KH * KW
    bound = 1.0 / (fan_in ** 0.5)
    weight = jax.random.uniform(k_w, (C_out, C_in, KH, KW), jnp.float32, -bound, bound)
    bias = jax.random.uniform(k_b, (C_out,), jnp.float32, -bound, bound)
    gamma = jnp.ones((C_out,), jnp.float32)   # BatchNorm2d weight default
    beta = jnp.zeros((C_out,), jnp.float32)   # BatchNorm2d bias default

    out = conv_bn_forward(x, weight, bias, gamma, beta, stride=1, padding=0)
    out = jax.block_until_ready(out)

    ref = _reference(x, weight, bias, gamma, beta, stride=1, padding=0)
    assert out.shape == (N, C_out, H - KH + 1, W - KW + 1), out.shape
    # Tolerance reflects the bf16 staging of the conv activation (y round-trips HBM in bf16);
    # the BN statistics themselves are computed in f32 from the MXU accumulator.
    max_err = float(jnp.max(jnp.abs(out - ref)))
    assert jnp.allclose(out, ref, atol=2e-2, rtol=2e-2), max_err

    print("KERNEL_OK")
</pallas_src>

<mosaic_0001>
module attributes {stable_mosaic.version = 11 : i64} {
  func.func @_conv_stats_kernel(%arg0: i32, %arg1: memref<1x258x4xbf16, #tpu.memory_space<vmem>>, %arg2: memref<9x4x128xbf16, #tpu.memory_space<vmem>>, %arg3: memref<224x1xf32, #tpu.memory_space<vmem>>, %arg4: memref<1x224x128xbf16, #tpu.memory_space<vmem>>, %arg5: memref<1x8x128xf32, #tpu.memory_space<vmem>>) attributes {dimension_semantics = [#tpu.dimension_semantics<parallel>], iteration_bounds = array<i64: 2>, scalar_prefetch = 0 : i64, scratch_operands = 0 : i64, tpu.core_type = #tpu.core_type<tc>, window_params = [{transform_indices = @transform_0, window_bounds = array<i64: 1, 258, 4>}, {pipeline_mode = #tpu.pipeline_mode<synchronous>, transform_indices = @transform_1, window_bounds = array<i64: 9, 4, 128>}, {pipeline_mode = #tpu.pipeline_mode<synchronous>, transform_indices = @transform_2, window_bounds = array<i64: 224, 1>}, {transform_indices = @transform_3, window_bounds = array<i64: 1, 224, 128>}, {transform_indices = @transform_4, window_bounds = array<i64: 1, 8, 128>}]} {
    %cst = arith.constant 0.000000e+00 : f32
    %0 = vector.broadcast %cst : f32 to vector<224x128xf32>
    %c0 = arith.constant 0 : index
    %c0_0 = arith.constant 0 : index
    %c0_1 = arith.constant 0 : index
    %1 = vector.load %arg1[%c0, %c0_0, %c0_1] : memref<1x258x4xbf16, #tpu.memory_space<vmem>>, vector<1x224x4xbf16>
    %2 = vector.shape_cast %1 : vector<1x224x4xbf16> to vector<224x4xbf16>
    %c0_2 = arith.constant 0 : index
    %c0_3 = arith.constant 0 : index
    %c0_4 = arith.constant 0 : index
    %3 = vector.load %arg2[%c0_2, %c0_3, %c0_4] : memref<9x4x128xbf16, #tpu.memory_space<vmem>>, vector<1x4x128xbf16>
    %4 = vector.shape_cast %3 : vector<1x4x128xbf16> to vector<4x128xbf16>
    %cst_5 = arith.constant dense<0.000000e+00> : vector<224x128xf32>
    %5 = tpu.matmul %2, %4, %cst_5 {dimension_numbers = #tpu.dot_dimension_numbers<[1], [0], [0], [1], [0, 0, 1, 1], [], []>} : vector<224x4xbf16>, vector<4x128xbf16>, vector<224x128xf32> -> vector<224x128xf32>
    %6 = arith.addf %0, %5 : vector<224x128xf32>
    %c0_6 = arith.constant 0 : index
    %c1 = arith.constant 1 : index
    %c0_7 = arith.constant 0 : index
    %7 = vector.load %arg1[%c0_6, %c1, %c0_7] : memref<1x258x4xbf16, #tpu.memory_space<vmem>>, vector<1x224x4xbf16>
    %8 = vector.shape_cast %7 : vector<1x224x4xbf16> to vector<224x4xbf16>
    %c1_8 = arith.constant 1 : index
    %c0_9 = arith.constant 0 : index
    %c0_10 = arith.constant 0 : index
    %9 = vector.load %arg2[%c1_8, %c0_9, %c0_10] : memref<9x4x128xbf16, #tpu.memory_space<vmem>>, vector<1x4x128xbf16>
    %10 = vector.shape_cast %9 : vector<1x4x128xbf16> to vector<4x128xbf16>
    %cst_11 = arith.constant dense<0.000000e+00> : vector<224x128xf32>
    %11 = tpu.matmul %8, %10, %cst_11 {dimension_numbers = #tpu.dot_dimension_numbers<[1], [0], [0], [1], [0, 0, 1, 1], [], []>} : vector<224x4xbf16>, vector<4x128xbf16>, vector<224x128xf32> -> vector<224x128xf32>
    %12 = arith.addf %6, %11 : vector<224x128xf32>
    %c0_12 = arith.constant 0 : index
    %c2 = arith.constant 2 : index
    %c0_13 = arith.constant 0 : index
    %13 = vector.load %arg1[%c0_12, %c2, %c0_13] : memref<1x258x4xbf16, #tpu.memory_space<vmem>>, vector<1x224x4xbf16>
    %14 = vector.shape_cast %13 : vector<1x224x4xbf16> to vector<224x4xbf16>
    %c2_14 = arith.constant 2 : index
    %c0_15 = arith.constant 0 : index
    %c0_16 = arith.constant 0 : index
    %15 = vector.load %arg2[%c2_14, %c0_15, %c0_16] : memref<9x4x128xbf16, #tpu.memory_space<vmem>>, vector<1x4x128xbf16>
    %16 = vector.shape_cast %15 : vector<1x4x128xbf16> to vector<4x128xbf16>
    %cst_17 = arith.constant dense<0.000000e+00> : vector<224x128xf32>
    %17 = tpu.matmul %14, %16, %cst_17 {dimension_numbers = #tpu.dot_dimension_numbers<[1], [0], [0], [1], [0, 0, 1, 1], [], []>} : vector<224x4xbf16>, vector<4x128xbf16>, vector<224x128xf32> -> vector<224x128xf32>
    %18 = arith.addf %12, %17 : vector<224x128xf32>
    %c0_18 = arith.constant 0 : index
    %c16 = arith.constant 16 : index
    %c0_19 = arith.constant 0 : index
    %19 = vector.load %arg1[%c0_18, %c16, %c0_19] : memref<1x258x4xbf16, #tpu.memory_space<vmem>>, vector<1x224x4xbf16>
    %20 = vector.shape_cast %19 : vector<1x224x4xbf16> to vector<224x4xbf16>
    %c3 = arith.constant 3 : index
    %c0_20 = arith.constant 0 : index
    %c0_21 = arith.constant 0 : index
    %21 = vector.load %arg2[%c3, %c0_20, %c0_21] : memref<9x4x128xbf16, #tpu.memory_space<vmem>>, vector<1x4x128xbf16>
    %22 = vector.shape_cast %21 : vector<1x4x128xbf16> to vector<4x128xbf16>
    %cst_22 = arith.constant dense<0.000000e+00> : vector<224x128xf32>
    %23 = tpu.matmul %20, %22, %cst_22 {dimension_numbers = #tpu.dot_dimension_numbers<[1], [0], [0], [1], [0, 0, 1, 1], [], []>} : vector<224x4xbf16>, vector<4x128xbf16>, vector<224x128xf32> -> vector<224x128xf32>
    %24 = arith.addf %18, %23 : vector<224x128xf32>
    %c0_23 = arith.constant 0 : index
    %c17 = arith.constant 17 : index
    %c0_24 = arith.constant 0 : index
    %25 = vector.load %arg1[%c0_23, %c17, %c0_24] : memref<1x258x4xbf16, #tpu.memory_space<vmem>>, vector<1x224x4xbf16>
    %26 = vector.shape_cast %25 : vector<1x224x4xbf16> to vector<224x4xbf16>
    %c4 = arith.constant 4 : index
    %c0_25 = arith.constant 0 : index
    %c0_26 = arith.constant 0 : index
    %27 = vector.load %arg2[%c4, %c0_25, %c0_26] : memref<9x4x128xbf16, #tpu.memory_space<vmem>>, vector<1x4x128xbf16>
    %28 = vector.shape_cast %27 : vector<1x4x128xbf16> to vector<4x128xbf16>
    %cst_27 = arith.constant dense<0.000000e+00> : vector<224x128xf32>
    %29 = tpu.matmul %26, %28, %cst_27 {dimension_numbers = #tpu.dot_dimension_numbers<[1], [0], [0], [1], [0, 0, 1, 1], [], []>} : vector<224x4xbf16>, vector<4x128xbf16>, vector<224x128xf32> -> vector<224x128xf32>
    %30 = arith.addf %24, %29 : vector<224x128xf32>
    %c0_28 = arith.constant 0 : index
    %c18 = arith.constant 18 : index
    %c0_29 = arith.constant 0 : index
    %31 = vector.load %arg1[%c0_28, %c18, %c0_29] : memref<1x258x4xbf16, #tpu.memory_space<vmem>>, vector<1x224x4xbf16>
    %32 = vector.shape_cast %31 : vector<1x224x4xbf16> to vector<224x4xbf16>
    %c5 = arith.constant 5 : index
    %c0_30 = arith.constant 0 : index
    %c0_31 = arith.constant 0 : index
    %33 = vector.load %arg2[%c5, %c0_30, %c0_31] : memref<9x4x128xbf16, #tpu.memory_space<vmem>>, vector<1x4x128xbf16>
    %34 = vector.shape_cast %33 : vector<1x4x128xbf16> to vector<4x128xbf16>
    %cst_32 = arith.constant dense<0.000000e+00> : vector<224x128xf32>
    %35 = tpu.matmul %32, %34, %cst_32 {dimension_numbers = #tpu.dot_dimension_numbers<[1], [0], [0], [1], [0, 0, 1, 1], [], []>} : vector<224x4xbf16>, vector<4x128xbf16>, vector<224x128xf32> -> vector<224x128xf32>
    %36 = arith.addf %30, %35 : vector<224x128xf32>
    %c0_33 = arith.constant 0 : index
    %c32 = arith.constant 32 : index
    %c0_34 = arith.constant 0 : index
    %37 = vector.load %arg1[%c0_33, %c32, %c0_34] : memref<1x258x4xbf16, #tpu.memory_space<vmem>>, vector<1x224x4xbf16>
    %38 = vector.shape_cast %37 : vector<1x224x4xbf16> to vector<224x4xbf16>
    %c6 = arith.constant 6 : index
    %c0_35 = arith.constant 0 : index
    %c0_36 = arith.constant 0 : index
    %39 = vector.load %arg2[%c6, %c0_35, %c0_36] : memref<9x4x128xbf16, #tpu.memory_space<vmem>>, vector<1x4x128xbf16>
    %40 = vector.shape_cast %39 : vector<1x4x128xbf16> to vector<4x128xbf16>
    %cst_37 = arith.constant dense<0.000000e+00> : vector<224x128xf32>
    %41 = tpu.matmul %38, %40, %cst_37 {dimension_numbers = #tpu.dot_dimension_numbers<[1], [0], [0], [1], [0, 0, 1, 1], [], []>} : vector<224x4xbf16>, vector<4x128xbf16>, vector<224x128xf32> -> vector<224x128xf32>
    %42 = arith.addf %36, %41 : vector<224x128xf32>
    %c0_38 = arith.constant 0 : index
    %c33 = arith.constant 33 : index
    %c0_39 = arith.constant 0 : index
    %43 = vector.load %arg1[%c0_38, %c33, %c0_39] : memref<1x258x4xbf16, #tpu.memory_space<vmem>>, vector<1x224x4xbf16>
    %44 = vector.shape_cast %43 : vector<1x224x4xbf16> to vector<224x4xbf16>
    %c7 = arith.constant 7 : index
    %c0_40 = arith.constant 0 : index
    %c0_41 = arith.constant 0 : index
    %45 = vector.load %arg2[%c7, %c0_40, %c0_41] : memref<9x4x128xbf16, #tpu.memory_space<vmem>>, vector<1x4x128xbf16>
    %46 = vector.shape_cast %45 : vector<1x4x128xbf16> to vector<4x128xbf16>
    %cst_42 = arith.constant dense<0.000000e+00> : vector<224x128xf32>
    %47 = tpu.matmul %44, %46, %cst_42 {dimension_numbers = #tpu.dot_dimension_numbers<[1], [0], [0], [1], [0, 0, 1, 1], [], []>} : vector<224x4xbf16>, vector<4x128xbf16>, vector<224x128xf32> -> vector<224x128xf32>
    %48 = arith.addf %42, %47 : vector<224x128xf32>
    %c0_43 = arith.constant 0 : index
    %c34 = arith.constant 34 : index
    %c0_44 = arith.constant 0 : index
    %49 = vector.load %arg1[%c0_43, %c34, %c0_44] : memref<1x258x4xbf16, #tpu.memory_space<vmem>>, vector<1x224x4xbf16>
    %50 = vector.shape_cast %49 : vector<1x224x4xbf16> to vector<224x4xbf16>
    %c8 = arith.constant 8 : index
    %c0_45 = arith.constant 0 : index
    %c0_46 = arith.constant 0 : index
    %51 = vector.load %arg2[%c8, %c0_45, %c0_46] : memref<9x4x128xbf16, #tpu.memory_space<vmem>>, vector<1x4x128xbf16>
    %52 = vector.shape_cast %51 : vector<1x4x128xbf16> to vector<4x128xbf16>
    %cst_47 = arith.constant dense<0.000000e+00> : vector<224x128xf32>
    %53 = tpu.matmul %50, %52, %cst_47 {dimension_numbers = #tpu.dot_dimension_numbers<[1], [0], [0], [1], [0, 0, 1, 1], [], []>} : vector<224x4xbf16>, vector<4x128xbf16>, vector<224x128xf32> -> vector<224x128xf32>
    %54 = arith.addf %48, %53 : vector<224x128xf32>
    %c0_48 = arith.constant 0 : index
    %c0_49 = arith.constant 0 : index
    %55 = vector.load %arg3[%c0_48, %c0_49] : memref<224x1xf32, #tpu.memory_space<vmem>>, vector<224x1xf32>
    %56 = vector.broadcast %55 : vector<224x1xf32> to vector<224x128xf32>
    %57 = arith.mulf %54, %56 : vector<224x128xf32>
    %cst_50 = arith.constant dense<0.000000e+00> : vector<128xf32>
    %58 = vector.multi_reduction <add>, %57, %cst_50 [0] : vector<224x128xf32> to vector<128xf32>
    %59 = vector.shape_cast %58 : vector<128xf32> to vector<1x128xf32>
    %c0_51 = arith.constant 0 : index
    %c0_52 = arith.constant 0 : index
    %c0_53 = arith.constant 0 : index
    %60 = vector.load %arg5[%c0_51, %c0_52, %c0_53] : memref<1x8x128xf32, #tpu.memory_space<vmem>>, vector<1x1x128xf32>
    %61 = vector.shape_cast %60 : vector<1x1x128xf32> to vector<1x128xf32>
    %62 = vector.shape_cast %59 : vector<1x128xf32> to vector<1x1x128xf32>
    tpu.vector_store %arg5[%c0_51, %c0_52, %c0_53], %62 {strides = array<i32>} : memref<1x8x128xf32, #tpu.memory_space<vmem>>, vector<1x1x128xf32>,
    %63 = arith.mulf %57, %57 : vector<224x128xf32>
    %cst_54 = arith.constant dense<0.000000e+00> : vector<128xf32>
    %64 = vector.multi_reduction <add>, %63, %cst_54 [0] : vector<224x128xf32> to vector<128xf32>
    %65 = vector.shape_cast %64 : vector<128xf32> to vector<1x128xf32>
    %c0_55 = arith.constant 0 : index
    %c1_56 = arith.constant 1 : index
    %c0_57 = arith.constant 0 : index
    %66 = vector.load %arg5[%c0_55, %c1_56, %c0_57] : memref<1x8x128xf32, #tpu.memory_space<vmem>>, vector<1x1x128xf32>
    %67 = vector.shape_cast %66 : vector<1x1x128xf32> to vector<1x128xf32>
    %68 = vector.shape_cast %65 : vector<1x128xf32> to vector<1x1x128xf32>
    tpu.vector_store %arg5[%c0_55, %c1_56, %c0_57], %68 {strides = array<i32>} : memref<1x8x128xf32, #tpu.memory_space<vmem>>, vector<1x1x128xf32>,
    %69 = arith.truncf %57 : vector<224x128xf32> to vector<224x128xbf16>
    %c0_58 = arith.constant 0 : index
    %c0_59 = arith.constant 0 : index
    %c0_60 = arith.constant 0 : index
    %70 = vector.load %arg4[%c0_58, %c0_59, %c0_60] : memref<1x224x128xbf16, #tpu.memory_space<vmem>>, vector<1x224x128xbf16>
    %71 = vector.shape_cast %70 : vector<1x224x128xbf16> to vector<224x128xbf16>
    %72 = vector.shape_cast %69 : vector<224x128xbf16> to vector<1x224x128xbf16>
    tpu.vector_store %arg4[%c0_58, %c0_59, %c0_60], %72 {strides = array<i32>} : memref<1x224x128xbf16, #tpu.memory_space<vmem>>, vector<1x224x128xbf16>,
    return
  }
  func.func @transform_0(%arg0: i32) -> (i32, i32, i32) {
    %c0_i32 = arith.constant 0 : i32
    %c0_i32_0 = arith.constant 0 : i32
    %c0_i32_1 = arith.constant 0 : i32
    return %arg0, %c0_i32, %c0_i32_0 : i32, i32, i32
  }
  func.func @transform_1(%arg0: i32) -> (i32, i32, i32) {
    %c0_i32 = arith.constant 0 : i32
    %c0_i32_0 = arith.constant 0 : i32
    %c0_i32_1 = arith.constant 0 : i32
    %c0_i32_2 = arith.constant 0 : i32
    return %c0_i32, %c0_i32_0, %c0_i32_1 : i32, i32, i32
  }
  func.func @transform_2(%arg0: i32) -> (i32, i32) {
    %c0_i32 = arith.constant 0 : i32
    %c0_i32_0 = arith.constant 0 : i32
    %c0_i32_1 = arith.constant 0 : i32
    return %c0_i32, %c0_i32_0 : i32, i32
  }
  func.func @transform_3(%arg0: i32) -> (i32, i32, i32) {
    %c0_i32 = arith.constant 0 : i32
    %c0_i32_0 = arith.constant 0 : i32
    %c0_i32_1 = arith.constant 0 : i32
    return %arg0, %c0_i32, %c0_i32_0 : i32, i32, i32
  }
  func.func @transform_4(%arg0: i32) -> (i32, i32, i32) {
    %c0_i32 = arith.constant 0 : i32
    %c0_i32_0 = arith.constant 0 : i32
    %c0_i32_1 = arith.constant 0 : i32
    return %arg0, %c0_i32, %c0_i32_0 : i32, i32, i32
  }
}

</mosaic_0001>

<bundles_post_ra>
// kernel: tpu_custom_call.1
= control target key start
LH: loop header
LB: loop body
LE: loop exit
PB: predicated region body
PF: predicated region fallthrough
CT: control target
= control target key end

     0   :  { %10 = vsyncpa [#allocation3], 0  ;;  %s4719_s0 = inlined_call_operand.vmem [shape: bf16[2,258,4], index: 0, kind: input, shape index: {}]   ;;  %s4720_s1 = inlined_call_operand.vmem [shape: bf16[9,4,128], index: 1, kind: input, shape index: {}]   ;;  %s4721_s2 = inlined_call_operand.vmem [shape: f32[224,1], index: 2, kind: input, shape index: {}]   ;;  %s4722_s3 = inlined_call_operand.hbm [shape: bf16[2,224,128], index: 3, kind: output, shape index: {0}]   ;;  %s4723_s4 = inlined_call_operand.hbm [shape: f32[2,8,128], index: 4, kind: output, shape index: {1}]  }
   0x1   :  { %12 = vsyncpa [#allocation3 + $0x1], 0 }
   0x2   :  { %13 = vsyncpa [#allocation5], 0 }
   0x3   :  { %15 = vsyncpa [#allocation5 + $0x1], 0  ;;  %s3723_s15 = smov 0   ;;  %s3725_s16 = smov 0  }
   0x4   :  { %s3727_s17 = smov 0   ;;  %s3729_s18 = smov 0  }
   0x5 LB: > { %s3744_s19 = sadd.s32 4294967295, %s3693_s18   ;;  %s2954_s20 = sadd.s32 4294967294, %s3693_s18   ;;  %s3693_s18 = sphi %s3729_s18, %s4740_s18   ;;  %s3689_s17 = sphi %s3727_s17, %s4739_s17   ;;  %s3685_s16 = sphi %s3725_s16, %s4738_s16   ;;  %s3681_s15 = sphi %s3723_s15, %s4737_s15  }
   0x6   : > { %s3748_s21 = sadd.s32 1, %s3693_s18   ;;  %s96_s22 = sadd.s32 1, %s3689_s17 }
   0x7   : > { %s93_s23 = ssub.s32 %s3693_s18, %s3748_s21  ;;  %p106_p0 = scmp.ne.s32.totalorder %s3689_s17, %s3685_s16 }
   0x8   : > { %p94_p1 = scmp.eq.s32.totalorder %s93_s23, 0  ;;  %p107_p2 = scmp.eq.s32.totalorder %s3744_s19, 1 }
   0x9   : > { %p112_p3 = scmp.ne.s32.totalorder %s3685_s16, %s3681_s15  ;;  %p113_p4 = scmp.eq.s32.totalorder %s2954_s20, 1 }
   0xa   : > { %s3759_s24 = scalar_select %p94_p1, %s3689_s17, %s96_s22  }
   0xb   : > { %p3761_p5 = por %p107_p2, %p106_p0  ;;  %p3765_p6 = por %p113_p4, %p112_p3 }
   0xc   : > { %p2957_p7 = scmp.ge.s32.totalorder %s3693_s18, 1  ;;  %p171_p8 = scmp.lt.s32.totalorder %s3693_s18, 3 }
   0xe   : > { %p172_p9 = pnand %p2957_p7, %p171_p8 }
  0x10   : > { %175 = sbr.rel (%p172_p9) target bundleno = 702 (0x2be), region = 32 }
  0x15   : > { %v2960_v0 = vld [vmem:[%s4720_s1 + $0x2] sm:$0x3]  ;;  %vm473_vm0 = vcmask 1041408   ;;  %p202_p10 = scmp.lt.s32.totalorder %s3744_s19, 1  ;;  %v3041_v2 = vld [vmem:[%s4720_s1 + $0x4] sm:$0x3] }
  0x16   : > { %v475_v1 = vsel %vm473_vm0, %v2960_v0, 0  ;;  %v236_v3 = vld [vmem:[%s4720_s1] sm:$0x3]  ;;  %v745_v4 = vsel %vm473_vm0, %v3041_v2, 0  ;;  %v3127_v6 = vld [vmem:[%s4720_s1 + $0x8] sm:$0x3] }
  0x17   : > { %3540 = vmatpush.bf16.msra.mxu1 %v475_v1  ;;  %3541 = vmatpush.bf16.msra.mxu2 %v475_v1  ;;  %s203_s7 = scalar_select %p202_p10, %s3744_s19, 1  ;;  %v585_v5 = vsel %vm473_vm0, %v236_v3, 0  ;;  %v1369_v7 = vsel %vm473_vm0, %v3127_v6, 0  ;;  %vm313_vm1 = vsmask.f32 7424  ;;  %vm430_vm2 = vcmask 31744  }
  0x18   : > { %484 = vmatpush.bf16.msra.mxu0 %v475_v1  ;;  %3542 = vmatpush.bf16.msra.mxu3 %v475_v1  ;;  %v3056_v45 = vld [vmem:[%s4720_s1 + $0x6] sm:$0x3]  ;;  %vm672_vm3 = vcmask 1046528   ;;  %s3619_s20 = scalar_lea.hbm %s4722_s3, 224 }
  0x19   : > { %s3544_s10 = smul.u32 132, %s203_s7  ;;  %v997_v54 = vsel %vm473_vm0, %v3056_v45, 0  ;;  %s4517_s7 = sand.u32 1, %s3685_s16  }
  0x1a   : > { %s2825_s8 = scalar_lea.sflag [#allocation3], %s4517_s7 }
  0x1b   : > { %754 = vmatpush.bf16.msrb.mxu2 %v745_v4  ;;  %594 = vmatpush.bf16.msrb.mxu1 %v585_v5  ;;  %s3792_s13 = scalar_lea.vmem %s4719_s0, %s3544_s10  ;;  %s3543_s10 = smul.u32 112, %s4517_s7 }
  0x1c   : > { %1378 = vmatpush.bf16.msrb.mxu0 %v1369_v7  ;;  %v3795_v8 = vld [vmem:[%s3792_s13 + $0x20] sm:$0xff]  ;;  %v3798_v9 = vld [vmem:[%s3792_s13 + $0x28] sm:$0xff]  ;;  %v3840_v37 = vld [vmem:[%s3792_s13 + $0x30] sm:$0xff]  ;;  %1006 = vmatpush.bf16.msrb.mxu3 %v997_v54 }
  0x1d   : > { %v3801_v10 = vld [vmem:[%s3792_s13 + $0x40] sm:$0xff]  ;;  %v3804_v11 = vld [vmem:[%s3792_s13 + $0x48] sm:$0xff]  ;;  %v346_v14 = vshll.u32 %v3795_v8, 16  ;;  %v350_v15 = vshrl.u32 %v3795_v8, 16  ;;  %v354_v16 = vshll.u32 %v3798_v9, 16  ;;  %v3843_v38 = vld [vmem:[%s3792_s13 + $0x50] sm:$0xff] }
  0x1e   : > { %v3807_v12 = vld [vmem:[%s3792_s13] sm:$0xff]   ;;  %v3810_v13 = vld [vmem:[%s3792_s13 + $0x8] sm:$0xff]  ;;  %v378_v17 = vshll.u32 %v3801_v10, 16  ;;  %v382_v18 = vshrl.u32 %v3801_v10, 16  ;;  %v386_v19 = vshll.u32 %v3804_v11, 16  ;;  %v3849_v42 = vld [vmem:[%s3792_s13 + $0x10] sm:$0xff] }
  0x1f   : > { %v315_v20 = vshrl.u32 %v3807_v12, 16  ;;  %v317_v21 = vshll.u32 %v3807_v12, 16  ;;  %v3820_v22 = vrot.slane %v346_v14, 1  ;;  %v356_v23 = vrot.slane %v354_v16, 1  ;;  %v3828_v31 = vld [vmem:[%s3792_s13 + $0x60] sm:$0xff]  ;;  %v3831_v32 = vld [vmem:[%s3792_s13 + $0x68] sm:$0xff] }
  0x20   : > { %v3822_v24 = vrot.slane %v378_v17, 1  ;;  %v322_v25 = vshll.u32 %v3810_v13, 16  ;;  %v388_v26 = vrot.slane %v386_v19, 1  ;;  %v410_v39 = vshll.u32 %v3828_v31, 16  ;;  %v237_v46 = vld [vmem:[%s3792_s13 + $0x70] sm:$0x1] }
  0x21   : > { %v319_v27 = vrot.slane %v317_v21, 1  ;;  %v352_v28 = vor.u32 %v350_v15, %v3820_v22  ;;  %v414_v40 = vshrl.u32 %v3828_v31, 16  ;;  %v418_v41 = vshll.u32 %v3831_v32, 16  ;;  %v3878_v5 = vld [vmem:[%s3792_s13 + $0x38] sm:$0xff]  ;;  %s4542_s14 = scalar_lea.vmem [#allocation2], %s3543_s10 }
  0x22   : > { %v384_v29 = vor.u32 %v382_v18, %v3822_v24  ;;  %v324_v30 = vrot.slane %v322_v25, 1  ;;  %v3851_v43 = vrot.slane %v410_v39, 1  ;;  %v358_v47 = vshrl.u32 %v3798_v9, 16  ;;  %v3881_v6 = vld [vmem:[%s3792_s13 + $0x58] sm:$0xff]  ;;  %s2842_s5 = sshll.u32 %s4542_s14, 4  ;;  %s2843_s5 = int_to_ptr.vmem [resolvable:$true] %s2842_s5 }
  0x23   : > { %v320_v33 = vor.u32 %v319_v27, %v315_v20  ;;  %v357_v34 = vsel %vm313_vm1, %v352_v28, %v356_v23  ;;  %v420_v44 = vrot.slane %v418_v41, 1  ;;  %v362_v48 = vshll.u32 %v3840_v37, 16  ;;  %v3884_v15 = vld [vmem:[%s3792_s13 + $0x18] sm:$0xff]  ;;  %v3194_v41 = vld [vmem:[%s4720_s1 + $0xa] sm:$0x3] }
  0x24   : > { %v389_v35 = vsel %vm313_vm1, %v384_v29, %v388_v26  ;;  %3017 = vmatmul.msk.bf16.vlgmr.msra.gmra.mxu1 %vm430_vm2, %v357_v34  ;;  %v390_v49 = vshrl.u32 %v3804_v11, 16  ;;  %v394_v50 = vshll.u32 %v3843_v38, 16  ;;  %v416_v51 = vor.u32 %v414_v40, %v3851_v43  ;;  %v3280_v40 = vld [vmem:[%s4720_s1 + $0xe] sm:$0x3] }
  0x25   : > { %3021 = vmatmul.msk.bf16.vlgmr.msra.gmra.mxu2 %vm430_vm2, %v389_v35  ;;  %v325_v36 = vsel %vm313_vm1, %v320_v33, %v324_v30  ;;  %v326_v52 = vshrl.u32 %v3810_v13, 16  ;;  %v330_v53 = vshll.u32 %v3849_v42, 16  ;;  %v297_v55 = vunpack.c.l.b16 %v237_v46  ;;  %v3347_v46 = vld [vmem:[%s4720_s1 + $0x10] sm:$0x3] }
  0x26   : > { %3013 = vmatmul.msk.bf16.vlgmr.msra.gmra.mxu0 %vm430_vm2, %v325_v36  ;;  %v421_v56 = vsel %vm313_vm1, %v416_v51, %v420_v44  ;;  %v360_v57 = vor.u32 %v358_v47, %v356_v23  ;;  %v364_v58 = vrot.slane %v362_v48, 1  ;;  %v392_v59 = vor.u32 %v390_v49, %v388_v26  ;;  %v3209_v36 = vld [vmem:[%s4720_s1 + $0xc] sm:$0x3] }
  0x27   : > { %3025 = vmatmul.msk.bf16.vlgmr.msra.gmra.mxu3 %vm430_vm2, %v421_v56  ;;  %v396_v60 = vrot.slane %v394_v50, 1  ;;  %v3867_v61 = vpack.c.b16 %v297_v55, %v297_v55  ;;  %v328_v62 = vor.u32 %v326_v52, %v324_v30  ;;  %v332_v63 = vrot.slane %v330_v53, 1  ;;  %v3380_v48 = vld [vmem:[%s3792_s13 + $0x8] sm:$0xff] }
  0x28   : > { %v365_v0 = vsel %vm313_vm1, %v360_v57, %v364_v58  ;;  %v422_v2 = vshrl.u32 %v3831_v32, 16  ;;  %v366_v16 = vshrl.u32 %v3840_v37, 16  ;;  %v370_v17 = vshll.u32 %v3878_v5, 16 }
  0x29   : > { %v397_v1 = vsel %vm313_vm1, %v392_v59, %v396_v60  ;;  %v426_v3 = vshll.u32 %v3867_v61, 16  ;;  %v333_v4 = vsel %vm313_vm1, %v328_v62, %v332_v63  ;;  %v398_v18 = vshrl.u32 %v3843_v38, 16  ;;  %v3516_v59 = vld [vmem:[%s3792_s13] sm:$0xf0]  ;;  %v3934_v62 = vld [vmem:[%s3792_s13 + $0x10] sm:$0xff] }
  0x2a   : > { %v424_v7 = vor.u32 %v422_v2, %v420_v44  ;;  %v402_v19 = vshll.u32 %v3881_v6, 16  ;;  %v334_v21 = vshrl.u32 %v3849_v42, 16  ;;  %v338_v23 = vshll.u32 %v3884_v15, 16 }
  0x2b   : > { %v428_v14 = vrot.slane %v426_v3, 1  ;;  %v368_v25 = vor.u32 %v366_v16, %v364_v58  ;;  %v372_v26 = vrot.slane %v370_v17, 1  ;;  %v400_v27 = vor.u32 %v398_v18, %v396_v60  ;;  %v3519_v58 = vld [vmem:[%s3792_s13 + $0x8] sm:$0xff]   ;;  %v3517_v60 = vld [vmem:[%s3792_s13] sm:$0xe]  ;;  %v3947_v17 = vld [vmem:[%s3792_s13 + $0x18] sm:$0xff] }
  0x2c   : > { %v404_v28 = vrot.slane %v402_v19, 1  ;;  %v336_v29 = vor.u32 %v334_v21, %v332_v63  ;;  %v340_v30 = vrot.slane %v338_v23, 1  ;;  %v1808_v39 = vsel %vm473_vm0, %v3209_v36, 0  ;;  %v3382_v18 = vld [vmem:[%s3792_s13 + $0x18] sm:$0xff] }
  0x2d   : > { %v429_v20 = vsel %vm313_vm1, %v424_v7, %v428_v14  ;;  %v373_v33 = vsel %vm313_vm1, %v368_v25, %v372_v26  ;;  %1817 = vmatpush.bf16.msra.mxu2 %v1808_v39  ;;  %v2180_v44 = vsel %vm473_vm0, %v3280_v40, 0  ;;  %v1556_v45 = vsel %vm473_vm0, %v3194_v41, 0  ;;  %v3975_v39 = vld [vmem:[%s3792_s13 + $0x28] sm:$0xff] }
  0x2e   : > { %v405_v34 = vsel %vm313_vm1, %v400_v27, %v404_v28  ;;  %v341_v35 = vsel %vm313_vm1, %v336_v29, %v340_v30  ;;  %2189 = vmatpush.bf16.msra.mxu3 %v2180_v44  ;;  %1565 = vmatpush.bf16.msra.mxu1 %v1556_v45  ;;  %v2367_v47 = vsel %vm473_vm0, %v3347_v46, 0  ;;  %v374_v49 = vshrl.u32 %v3878_v5, 16  ;;  %v3961_v27 = vld [vmem:[%s3792_s13 + $0x20] sm:$0xff]  ;;  %v3384_v40 = vld [vmem:[%s3792_s13 + $0x28] sm:$0xff] }
  0x2f   : > { %2376 = vmatpush.bf16.msra.mxu0 %v2367_v47  ;;  %v406_v50 = vshrl.u32 %v3881_v6, 16  ;;  %v342_v51 = vshrl.u32 %v3884_v15, 16  ;;  %v1213_v63 = vshll.u32 %v3519_v58, 16  ;;  %v674_v3 = vrot.slane %v3810_v13, 1 }
  0x30   : > { %v376_v52 = vor.u32 %v374_v49, %v372_v26  ;;  %v1222_v19 = vshrl.u32 %v3934_v62, 16  ;;  %v676_v21 = vrot.slane %v3849_v42, 1  ;;  %v1230_v29 = vshrl.u32 %v3947_v17, 16  ;;  %v3989_v49 = vld [vmem:[%s3792_s13 + $0x30] sm:$0xff] }
  0x31   : > { %v408_v53 = vor.u32 %v406_v50, %v404_v28  ;;  %v344_v54 = vor.u32 %v342_v51, %v340_v30  ;;  %v3383_v28 = vld [vmem:[%s3792_s13 + $0x20] sm:$0xff]  ;;  %v1234_v30 = vshll.u32 %v3961_v27, 16  ;;  %v1238_v41 = vshrl.u32 %v3961_v27, 16  ;;  %v3385_v50 = vld [vmem:[%s3792_s13 + $0x30] sm:$0xff] }
  0x32   : > { %v381_v55 = vsel %vm313_vm1, %v376_v52, %v3822_v24  ;;  %v3518_v24 = vor.u32 %v3517_v60, %v3516_v59  ;;  %v1242_v44 = vshll.u32 %v3975_v39, 16  ;;  %v680_v45 = vrot.slane %v3795_v8, 1  ;;  %v4007_v59 = vld [vmem:[%s3792_s13 + $0x38] sm:$0xff] }
  0x33   : > { %v413_v56 = vsel %vm313_vm1, %v408_v53, %v3851_v43  ;;  %v349_v57 = vsel %vm313_vm1, %v344_v54, %v3820_v22  ;;  %v1211_v43 = vshrl.u32 %v3519_v58, 16  ;;  %v1218_v22 = vshll.u32 %v3934_v62, 16 }
  0x34   : > { %3018 = vmatmul.msk.bf16.gmra.mxu1 %vm430_vm2, %v365_v0  ;;  %v3381_v0 = vld [vmem:[%s3792_s13 + $0x10] sm:$0xff]  ;;  %v673_v2 = vrot.slane %v3518_v24, 1  ;;  %v1244_v47 = vrot.slane %v1242_v44, 1  ;;  %v1246_v51 = vshrl.u32 %v3975_v39, 16  ;;  %v1250_v52 = vshll.u32 %v3989_v49, 16 }
  0x35   : > { %3022 = vmatmul.msk.bf16.gmra.mxu2 %vm430_vm2, %v397_v1  ;;  %v1215_v1 = vrot.slane %v1213_v63, 1  ;;  %v1220_v7 = vrot.slane %v1218_v22, 1  ;;  %v682_v53 = vrot.slane %v3798_v9, 1  ;;  %v3386_v63 = vld [vmem:[%s3792_s13 + $0x38] sm:$0xff] }
  0x36   : > { %3014 = vmatmul.msk.bf16.gmra.mxu0 %vm430_vm2, %v333_v4  ;;  %v675_v14 = vsel %vm672_vm3, %v673_v2, %v674_v3  ;;  %v1248_v54 = vor.u32 %v1246_v51, %v1244_v47 }
  0x37   : > { %3026 = vmatmul.msk.bf16.gmra.mxu3 %vm430_vm2, %v429_v20  ;;  %v1216_v4 = vor.u32 %v1215_v1, %v1211_v43  ;;  %v1226_v20 = vshll.u32 %v3947_v17, 16  ;;  %v1224_v23 = vor.u32 %v1222_v19, %v1220_v7  ;;  %v1254_v43 = vshrl.u32 %v3989_v49, 16  ;;  %v4035_v19 = vld [vmem:[%s3792_s13 + $0x40] sm:$0xff] }
  0x38   : > { %v1258_v1 = vshll.u32 %v4007_v59, 16 }
  0x39   : > { %v1221_v16 = vsel %vm313_vm1, %v1216_v4, %v1220_v7  ;;  %v1228_v25 = vrot.slane %v1226_v20, 1 }
  0x3a   : > { %v1260_v2 = vrot.slane %v1258_v1, 1 }
  0x3b   : > { %v1229_v26 = vsel %vm313_vm1, %v1224_v23, %v1228_v25  ;;  %v3387_v23 = vld [vmem:[%s3792_s13 + $0x40] sm:$0xff] }
  0x44   : > { %3019 = vmatmul.msk.bf16.gmra.mxu1 %vm430_vm2, %v373_v33  ;;  %v678_v33 = vrot.slane %v3884_v15, 1 }
  0x45   : > { %3023 = vmatmul.msk.bf16.gmra.mxu2 %vm430_vm2, %v405_v34  ;;  %v1232_v34 = vor.u32 %v1230_v29, %v1228_v25 }
  0x46   : > { %3015 = vmatmul.msk.bf16.gmra.mxu0 %vm430_vm2, %v341_v35  ;;  %v1236_v35 = vrot.slane %v1234_v30, 1 }
  0x47   : > { %3113 = vmatmul.msk.bf16.vlgmr.msrb.gmra.mxu3 %vm430_vm2, %v3380_v48 }
  0x48   : > { %v1237_v36 = vsel %vm313_vm1, %v1232_v34, %v1236_v35  ;;  %v1240_v46 = vor.u32 %v1238_v41, %v1236_v35  ;;  %v4065_v41 = vld [vmem:[%s3792_s13 + $0x48] sm:$0xff] }
  0x4a   : > { %v1245_v48 = vsel %vm313_vm1, %v1240_v46, %v1244_v47  ;;  %v3388_v46 = vld [vmem:[%s3792_s13 + $0x48] sm:$0xff] }
  0x54   : > { %3020 = vmatmul.msk.bf16.gmra.mxu1 %vm430_vm2, %v381_v55  ;;  %v1252_v55 = vrot.slane %v1250_v52, 1 }
  0x55   : > { %3024 = vmatmul.msk.bf16.gmra.mxu2 %vm430_vm2, %v413_v56  ;;  %v683_v56 = vsel %vm672_vm3, %v680_v45, %v682_v53 }
  0x56   : > { %3016 = vmatmul.msk.bf16.gmra.mxu0 %vm430_vm2, %v349_v57  ;;  %v1253_v58 = vsel %vm313_vm1, %v1248_v54, %v1252_v55  ;;  %v1256_v22 = vor.u32 %v1254_v43, %v1252_v55  ;;  %v4093_v43 = vld [vmem:[%s3792_s13 + $0x50] sm:$0xff] }
  0x57   : > { %3114 = vmatmul.msk.bf16.gmra.mxu3 %vm430_vm2, %v3381_v0  ;;  %4728 = vst [vmem:[#allocation9_spill] sm:$0xff] %v4093_v43 }
  0x64   : > { %3027 = vmatmul.msk.bf16.vlgmr.msrb.gmra.mxu1 %vm430_vm2, %v3807_v12  ;;  %v677_v12 = vsel %vm672_vm3, %v674_v3, %v676_v21 }
  0x65   : > { %3042 = vmatmul.msk.bf16.vlgmr.msrb.gmra.mxu2 %vm430_vm2, %v675_v14 }
  0x66   : > { %3180 = vmatmul.msk.bf16.vlgmr.msrb.gmra.mxu0 %vm430_vm2, %v1221_v16 }
  0x67   : > { %3115 = vmatmul.msk.bf16.gmra.mxu3 %vm430_vm2, %v3382_v18  ;;  %v1261_v18 = vsel %vm313_vm1, %v1256_v22, %v1260_v2  ;;  %v3389_v22 = vld [vmem:[%s3792_s13 + $0x50] sm:$0xff] }
  0x74   : > { %3028 = vmatmul.msk.bf16.gmra.mxu1 %vm430_vm2, %v3810_v13  ;;  %v679_v13 = vsel %vm672_vm3, %v676_v21, %v678_v33 }
  0x75   : > { %3043 = vmatmul.msk.bf16.gmra.mxu2 %vm430_vm2, %v677_v12 }
  0x76   : > { %3181 = vmatmul.msk.bf16.gmra.mxu0 %vm430_vm2, %v1229_v26  ;;  %v1262_v26 = vshrl.u32 %v4007_v59, 16 }
  0x77   : > { %3116 = vmatmul.msk.bf16.gmra.mxu3 %vm430_vm2, %v3383_v28  ;;  %v686_v28 = vrot.slane %v3878_v5, 1 }
  0x78   : > { %v1264_v29 = vor.u32 %v1262_v26, %v1260_v2 }
  0x84   : > { %3029 = vmatmul.msk.bf16.gmra.mxu1 %vm430_vm2, %v3849_v42  ;;  %v681_v42 = vsel %vm672_vm3, %v678_v33, %v680_v45 }
  0x85   : > { %3044 = vmatmul.msk.bf16.gmra.mxu2 %vm430_vm2, %v679_v13 }
  0x86   : > { %3182 = vmatmul.msk.bf16.gmra.mxu0 %vm430_vm2, %v1237_v36 }
  0x87   : > { %3117 = vmatmul.msk.bf16.gmra.mxu3 %vm430_vm2, %v3384_v40 }
  0x94   : > { %3030 = vmatmul.msk.bf16.gmra.mxu1 %vm430_vm2, %v3884_v15 }
  0x95   : > { %3045 = vmatmul.msk.bf16.gmra.mxu2 %vm430_vm2, %v681_v42 }
  0x96   : > { %3183 = vmatmul.msk.bf16.gmra.mxu0 %vm430_vm2, %v1245_v48  ;;  %v1270_v48 = vshrl.u32 %v4035_v19, 16 }
  0x97   : > { %3118 = vmatmul.msk.bf16.gmra.mxu3 %vm430_vm2, %v3385_v50  ;;  %v688_v50 = vrot.slane %v3801_v10, 1 }
  0xa1   : > { %v3996_v15 = vpop.f32.mrf.mxu1 }
  0xa3   : > { %v3999_v57 = vpop.f32.mrf.mxu0 }
  0xa4   : > { %3031 = vmatmul.msk.bf16.gmra.mxu1 %vm430_vm2, %v3795_v8  ;;  %v684_v8 = vrot.slane %v3840_v37, 1 }
  0xa5   : > { %3046 = vmatmul.msk.bf16.gmra.mxu2 %vm430_vm2, %v683_v56  ;;  %v689_v56 = vsel %vm672_vm3, %v686_v28, %v688_v50 }
  0xa6   : > { %3184 = vmatmul.msk.bf16.gmra.mxu0 %vm430_vm2, %v1253_v58  ;;  %v685_v14 = vsel %vm672_vm3, %v682_v53, %v684_v8  ;;  %v687_v13 = vsel %vm672_vm3, %v684_v8, %v686_v28 }
  0xa7   : > { %3119 = vmatmul.msk.bf16.gmra.mxu3 %vm430_vm2, %v3386_v63 }
  0xa8   : > { %v4009_v60 = vpop.f32.mrf.mxu2 }
  0xa9   : > { %v4012_v0 = vpop.f32.mrf.mxu1 }
  0xaa   : > { %v4022_v4 = vpop.f32.mrf.mxu3 }
  0xab   : > { %v4014_v24 = vpop.f32.mrf.mxu0 }
  0xb0   : > { %v4020_v3 = vpop.f32.mrf.mxu2 }
  0xb1   : > { %v4024_v7 = vpop.f32.mrf.mxu1 }
  0xb2   : > { %v4039_v21 = vpop.f32.mrf.mxu3 }
  0xb3   : > { %v4027_v16 = vpop.f32.mrf.mxu0 }
  0xb4   : > { %3032 = vmatmul.msk.bf16.gmra.mxu1 %vm430_vm2, %v3798_v9  ;;  %v1266_v9 = vshll.u32 %v4035_v19, 16 }
  0xb5   : > { %3047 = vmatmul.msk.bf16.gmra.mxu2 %vm430_vm2, %v685_v14 }
  0xb6   : > { %3185 = vmatmul.msk.bf16.gmra.mxu0 %vm430_vm2, %v1261_v18  ;;  %v1268_v30 = vrot.slane %v1266_v9, 1  ;;  %v1278_v18 = vshrl.u32 %v4065_v41, 16 }
  0xb7   : > { %3120 = vmatmul.msk.bf16.gmra.mxu3 %vm430_vm2, %v3387_v23  ;;  %v1282_v23 = vshll.u32 %v4093_v43, 16 }
  0xb8   : > { %v4037_v20 = vpop.f32.mrf.mxu2  ;;  %v1269_v40 = vsel %vm313_vm1, %v1264_v29, %v1268_v30  ;;  %v1272_v51 = vor.u32 %v1270_v48, %v1268_v30 }
  0xb9   : > { %v4042_v25 = vpop.f32.mrf.mxu1  ;;  %v1284_v9 = vrot.slane %v1282_v23, 1  ;;  %v1286_v23 = vshrl.u32 %v4093_v43, 16 }
  0xba   : > { %v4052_v34 = vpop.f32.mrf.mxu3 }
  0xbb   : > { %v4044_v12 = vpop.f32.mrf.mxu0 }
  0xc0   : > { %v4050_v33 = vpop.f32.mrf.mxu2 }
  0xc1   : > { %v4054_v35 = vpop.f32.mrf.mxu1 }
  0xc2   : > { %v4069_v45 = vpop.f32.mrf.mxu3 }
  0xc3   : > { %v4057_v36 = vpop.f32.mrf.mxu0  ;;  %4727 = vst [vmem:[#allocation8_spill] sm:$0xff] %v4069_v45 }
  0xc4   : > { %3033 = vmatmul.msk.bf16.gmra.mxu1 %vm430_vm2, %v3840_v37  ;;  %v1274_v37 = vshll.u32 %v4065_v41, 16 }
  0xc5   : > { %3048 = vmatmul.msk.bf16.gmra.mxu2 %vm430_vm2, %v687_v13 }
  0xc6   : > { %3186 = vmatmul.msk.bf16.gmra.mxu0 %vm430_vm2, %v1269_v40  ;;  %v1276_v52 = vrot.slane %v1274_v37, 1  ;;  %v4116_v37 = vld [vmem:[%s3792_s13 + $0x58] sm:$0xff] }
  0xc7   : > { %3121 = vmatmul.msk.bf16.gmra.mxu3 %vm430_vm2, %v3388_v46 }
  0xc8   : > { %v4067_v44 = vpop.f32.mrf.mxu2  ;;  %v1277_v63 = vsel %vm313_vm1, %v1272_v51, %v1276_v52  ;;  %v1280_v26 = vor.u32 %v1278_v18, %v1276_v52 }
  0xc9   : > { %v4072_v47 = vpop.f32.mrf.mxu1 }
  0xca   : > { %v1008_v54 = vpop.f32.mrf.mxu3  ;;  %v1285_v48 = vsel %vm313_vm1, %v1280_v26, %v1284_v9  ;;  %v1290_v26 = vshll.u32 %v4116_v37, 16 }
  0xcb   : > { %v4074_v42 = vpop.f32.mrf.mxu0 }
  0xd0   : > { %v4080_v53 = vpop.f32.mrf.mxu2 }
  0xd1   : > { %v4082_v55 = vpop.f32.mrf.mxu1 }
  0xd2   : > { %v1010_v8 = vpop.f32.mrf.mxu3 }
  0xd3   : > { %v4085_v58 = vpop.f32.mrf.mxu0 }
  0xd4   : > { %3034 = vmatmul.msk.bf16.gmra.mxu1 %vm430_vm2, %v3878_v5  ;;  %v690_v5 = vrot.slane %v3804_v11, 1 }
  0xd5   : > { %3049 = vmatmul.msk.bf16.gmra.mxu2 %vm430_vm2, %v689_v56 }
  0xd6   : > { %3187 = vmatmul.msk.bf16.gmra.mxu0 %vm430_vm2, %v1277_v63  ;;  %v691_v13 = vsel %vm672_vm3, %v688_v50, %v690_v5  ;;  %v3390_v63 = vld [vmem:[%s3792_s13 + $0x58] sm:$0xff] }
  0xd7   : > { %3122 = vmatmul.msk.bf16.gmra.mxu3 %vm430_vm2, %v3389_v22 }
  0xd8   : > { %v4095_v1 = vpop.f32.mrf.mxu2 }
  0xd9   : > { %v4098_v2 = vpop.f32.mrf.mxu1 }
  0xda   : > { %v1013_v29 = vpop.f32.mrf.mxu3 }
  0xdb   : > { %v4100_v14 = vpop.f32.mrf.mxu0 }
  0xe0   : > { %v4106_v28 = vpop.f32.mrf.mxu2 }
  0xe1   : > { %v596_v30 = vpop.f32.mrf.mxu1 }
  0xe2   : > { %v597_v40 = vadd.f32 %v596_v30, %v3999_v57  ;;  %v1015_v52 = vpop.f32.mrf.mxu3  ;;  %v692_v30 = vrot.slane %v3843_v38, 1 }
  0xe3   : > { %v1380_v46 = vpop.f32.mrf.mxu0 }
  0xe4   : > { %3035 = vmatmul.msk.bf16.gmra.mxu1 %vm430_vm2, %v3801_v10 }
  0xe5   : > { %3050 = vmatmul.msk.bf16.gmra.mxu2 %vm430_vm2, %v691_v13  ;;  %v1288_v13 = vor.u32 %v1286_v23, %v1284_v9 }
  0xe6   : > { %3188 = vmatmul.msk.bf16.gmra.mxu0 %vm430_vm2, %v1285_v48  ;;  %v1292_v48 = vrot.slane %v1290_v26, 1 }
  0xe7   : > { %3123 = vmatmul.msk.bf16.gmra.mxu3 %vm430_vm2, %v3390_v63 }
  0xe8   : > { %v756_v51 = vpop.f32.mrf.mxu2  ;;  %v1293_v63 = vsel %vm313_vm1, %v1288_v13, %v1292_v48  ;;  %v1294_v13 = vshrl.u32 %v4116_v37, 16 }
  0xe9   : > { %v826_v56 = vadd.f32 %v756_v51, %v597_v40  ;;  %v598_v22 = vpop.f32.mrf.mxu1 }
  0xea   : > { %v599_v57 = vadd.f32 %v598_v22, %v4014_v24  ;;  %v1018_v51 = vpop.f32.mrf.mxu3  ;;  %v693_v24 = vsel %vm672_vm3, %v690_v5, %v692_v30  ;;  %v3391_v5 = vld [vmem:[%s3792_s13 + $0x60] sm:$0xff] }
  0xeb   : > { %v1078_v50 = vadd.f32 %v1008_v54, %v826_v56  ;;  %v1382_v18 = vpop.f32.mrf.mxu0 }
  0xed   : > { %v4123_v10 = vadd.f32 %v1380_v46, %v1078_v50  ;;  %v3404_v46 = vld [vmem:[%s3792_s13 + $0x60] sm:$0xff] }
  0xf0   : > { %v758_v40 = vpop.f32.mrf.mxu2 }
  0xf1   : > { %v827_v54 = vadd.f32 %v758_v40, %v599_v57  ;;  %v601_v56 = vpop.f32.mrf.mxu1 }
  0xf2   : > { %v602_v45 = vadd.f32 %v601_v56, %v4027_v16  ;;  %v1020_v57 = vpop.f32.mrf.mxu3  ;;  %v1296_v56 = vor.u32 %v1294_v13, %v1292_v48  ;;  %v3405_v48 = vld [vmem:[%s3792_s13 + $0x68] sm:$0xff] }
  0xf3   : > { %v1079_v22 = vadd.f32 %v1010_v8, %v827_v54  ;;  %v1385_v43 = vpop.f32.mrf.mxu0  ;;  %v1298_v54 = vshll.u32 %v3404_v46, 16 }
  0xf4   : > { %3036 = vmatmul.msk.bf16.gmra.mxu1 %vm430_vm2, %v3804_v11 }
  0xf5   : > { %3051 = vmatmul.msk.bf16.gmra.mxu2 %vm430_vm2, %v693_v24  ;;  %v4132_v9 = vadd.f32 %v1382_v18, %v1079_v22  ;;  %v694_v18 = vrot.slane %v3881_v6, 1  ;;  %v1300_v24 = vrot.slane %v1298_v54, 1 }
  0xf6   : > { %3189 = vmatmul.msk.bf16.gmra.mxu0 %vm430_vm2, %v1293_v63 }
  0xf7   : > { %3124 = vmatmul.msk.bf16.gmra.mxu3 %vm430_vm2, %v3391_v5  ;;  %v1301_v5 = vsel %vm313_vm1, %v1296_v56, %v1300_v24  ;;  %v1302_v56 = vshrl.u32 %v3404_v46, 16 }
  0xf8   : > { %v761_v50 = vpop.f32.mrf.mxu2 }
  0xf9   : > { %v828_v23 = vadd.f32 %v761_v50, %v602_v45  ;;  %v603_v8 = vpop.f32.mrf.mxu1 }
  0xfa   : > { %v604_v16 = vadd.f32 %v603_v8, %v4044_v12  ;;  %v1023_v45 = vpop.f32.mrf.mxu3  ;;  %v695_v12 = vsel %vm672_vm3, %v692_v30, %v694_v18  ;;  %v3392_v30 = vld [vmem:[%s3792_s13 + $0x68] sm:$0xff] }
  0xfb   : > { %v1080_v26 = vadd.f32 %v1013_v29, %v828_v23  ;;  %v1387_v40 = vpop.f32.mrf.mxu0 }
  0xfd   : > { %v4140_v11 = vadd.f32 %v1385_v43, %v1080_v26 }
 0x100   : > { %v763_v22 = vpop.f32.mrf.mxu2 }
 0x101   : > { %v829_v63 = vadd.f32 %v763_v22, %v604_v16  ;;  %v606_v29 = vpop.f32.mrf.mxu1 }
 0x102   : > { %v607_v23 = vadd.f32 %v606_v29, %v4057_v36  ;;  %v1025_v16 = vpop.f32.mrf.mxu3  ;;  %v1304_v29 = vor.u32 %v1302_v56, %v1300_v24 }
 0x103   : > { %v1081_v50 = vadd.f32 %v1015_v52, %v829_v63  ;;  %v1390_v8 = vpop.f32.mrf.mxu0  ;;  %v1306_v63 = vshll.u32 %v3405_v48, 16 }
 0x104   : > { %3037 = vmatmul.msk.bf16.gmra.mxu1 %vm430_vm2, %v3843_v38 }
 0x105   : > { %3052 = vmatmul.msk.bf16.gmra.mxu2 %vm430_vm2, %v695_v12  ;;  %v4149_v43 = vadd.f32 %v1387_v40, %v1081_v50  ;;  %v696_v40 = vrot.slane %v3828_v31, 1  ;;  %v1308_v12 = vrot.slane %v1306_v63, 1 }
 0x106   : > { %3190 = vmatmul.msk.bf16.gmra.mxu0 %vm430_vm2, %v1301_v5 }
 0x107   : > { %3125 = vmatmul.msk.bf16.gmra.mxu3 %vm430_vm2, %v3392_v30  ;;  %v1309_v30 = vsel %vm313_vm1, %v1304_v29, %v1308_v12  ;;  %v1310_v29 = vshrl.u32 %v3405_v48, 16 }
 0x108   : > { %v766_v26 = vpop.f32.mrf.mxu2 }
 0x109   : > { %v830_v13 = vadd.f32 %v766_v26, %v607_v23  ;;  %v608_v52 = vpop.f32.mrf.mxu1 }
 0x10a   : > { %v609_v36 = vadd.f32 %v608_v52, %v4074_v42  ;;  %v1028_v5 = vpop.f32.mrf.mxu3 }
 0x10b   : > { %v1082_v54 = vadd.f32 %v1018_v51, %v830_v13  ;;  %v1392_v22 = vpop.f32.mrf.mxu0  ;;  %v697_v51 = vsel %vm672_vm3, %v694_v18, %v696_v40 }
 0x10d   : > { %v4156_v38 = vadd.f32 %v1390_v8, %v1082_v54  ;;  %v3406_v8 = vld [vmem:[%s3792_s13 + $0x70] sm:$0xff] }
 0x10e   : > { %v3393_v54 = vld [vmem:[%s3792_s13 + $0x70] sm:$0xff] }
 0x10f   : > { %4729 = vst [vmem:[#allocation10_spill] sm:$0xff] %v4156_v38 }
 0x110   : > { %v768_v50 = vpop.f32.mrf.mxu2 }
 0x111   : > { %v831_v23 = vadd.f32 %v768_v50, %v609_v36  ;;  %v611_v26 = vpop.f32.mrf.mxu1  ;;  %v3523_v50 = vld [vmem:[%s3792_s13 + $0x10] sm:$0xff]  }
 0x112   : > { %v612_v46 = vadd.f32 %v611_v26, %v4085_v58  ;;  %v1030_v18 = vpop.f32.mrf.mxu3  ;;  %v4177_v26 = vld [vmem:[%s3792_s13 + $0x18] sm:$0xff] }
 0x113   : > { %v1083_v42 = vadd.f32 %v1020_v57, %v831_v23  ;;  %v1395_v13 = vpop.f32.mrf.mxu0  ;;  %v698_v23 = vrot.slane %v3831_v32, 1 }
 0x114   : > { %3038 = vmatmul.msk.bf16.gmra.mxu1 %vm430_vm2, %v3881_v6  ;;  %v1314_v6 = vshll.u32 %v3406_v8, 16 }
 0x115   : > { %3053 = vmatmul.msk.bf16.gmra.mxu2 %vm430_vm2, %v697_v51  ;;  %v4165_v24 = vadd.f32 %v1392_v22, %v1083_v42  ;;  %v2024_v51 = vshll.u32 %v3523_v50, 16  ;;  %v1312_v42 = vor.u32 %v1310_v29, %v1308_v12  ;;  %v699_v48 = vsel %vm672_vm3, %v696_v40, %v698_v23 }
 0x116   : > { %3191 = vmatmul.msk.bf16.gmra.mxu0 %vm430_vm2, %v1309_v30 }
 0x117   : > { %4730 = vst [vmem:[#allocation11_spill] sm:$0xff] %v4165_v24  ;;  %3126 = vmatmul.msk.bf16.gmra.mxu3 %vm430_vm2, %v3393_v54  ;;  %v2026_v24 = vrot.slane %v2024_v51, 1 }
 0x118   : > { %v771_v52 = vpop.f32.mrf.mxu2 }
 0x119   : > { %v832_v57 = vadd.f32 %v771_v52, %v612_v46  ;;  %v613_v58 = vpop.f32.mrf.mxu1  ;;  %v1316_v46 = vrot.slane %v1314_v6, 1 }
 0x11a   : > { %v614_v56 = vadd.f32 %v613_v58, %v4100_v14  ;;  %v4179_v52 = vpop.f32.mrf.mxu3  ;;  %v2022_v58 = vshrl.u32 %v3523_v50, 16 }
 0x11b   : > { %v1084_v36 = vadd.f32 %v1023_v45, %v832_v57  ;;  %v1397_v63 = vpop.f32.mrf.mxu0  ;;  %v1134_v45 = vld [vmem:[%s3792_s13 + $0x78] sm:$0x1] }
 0x11c   : > { %v1194_v38 = vunpack.c.l.b16 %v1134_v45 }
 0x11d   : > { %v4173_v22 = vadd.f32 %v1395_v13, %v1084_v36  ;;  %v2029_v13 = vshll.u32 %v4177_v26, 16 }
 0x11e   : > { %v4192_v6 = vpack.c.b16 %v1194_v38, %v1194_v38  ;;  %v4203_v38 = vld [vmem:[%s3792_s13 + $0x20] sm:$0xff] }
 0x11f   : > { %4731 = vst [vmem:[#allocation12_spill] sm:$0xff] %v4173_v22  ;;  %v1317_v22 = vsel %vm313_vm1, %v1312_v42, %v1316_v46  ;;  %v2031_v40 = vrot.slane %v2029_v13, 1 }
 0x120   : > { %v773_v30 = vpop.f32.mrf.mxu2 }
 0x121   : > { %v833_v14 = vadd.f32 %v773_v30, %v614_v56  ;;  %v616_v57 = vpop.f32.mrf.mxu1  ;;  %v2027_v56 = vor.u32 %v2026_v24, %v2022_v58 }
 0x122   : > { %v617_v29 = vadd.f32 %v616_v57, %v3996_v15  ;;  %v4194_v50 = vpop.f32.mrf.mxu3  ;;  %v700_v15 = vrot.slane %v3867_v61, 1  ;;  %v2037_v61 = vshll.u32 %v4203_v38, 16 }
 0x123   : > { %v1085_v54 = vadd.f32 %v1025_v16, %v833_v14  ;;  %v1400_v36 = vpop.f32.mrf.mxu0  ;;  %v1322_v14 = vshll.u32 %v4192_v6, 16 }
 0x124   : > { %3039 = vmatmul.msk.bf16.gmra.mxu1 %vm430_vm2, %v3828_v31  ;;  %v2032_v31 = vsel %vm313_vm1, %v2027_v56, %v2031_v40 }
 0x125   : > { %3054 = vmatmul.msk.bf16.gmra.mxu2 %vm430_vm2, %v699_v48  ;;  %v4188_v12 = vadd.f32 %v1397_v63, %v1085_v54  ;;  %v1318_v63 = vshrl.u32 %v3406_v8, 16  ;;  %v1324_v48 = vrot.slane %v1322_v14, 1  ;;  %v701_v54 = vsel %vm672_vm3, %v698_v23, %v700_v15 }
 0x126   : > { %3192 = vmatmul.msk.bf16.gmra.mxu0 %vm430_vm2, %v1317_v22 }
 0x127   : > { %3333 = vmatmul.msk.bf16.vlgmr.msra.gmra.mxu3 %vm430_vm2, %v2032_v31  ;;  %v1320_v57 = vor.u32 %v1318_v63, %v1316_v46  ;;  %v3521_v31 = vld [vmem:[%s3792_s13 + $0x8] sm:$0xe]  ;;  %v3525_v63 = vld [vmem:[%s3792_s13 + $0x10] sm:$0xe] }
 0x128   : > { %v776_v16 = vpop.f32.mrf.mxu2 }
 0x129   : > { %v834_v51 = vadd.f32 %v776_v16, %v617_v29  ;;  %v618_v42 = vpop.f32.mrf.mxu1  ;;  %v2039_v16 = vrot.slane %v2037_v61, 1 }
 0x12a   : > { %v619_v22 = vadd.f32 %v618_v42, %v4012_v0  ;;  %v4206_v13 = vpop.f32.mrf.mxu3  ;;  %v1325_v0 = vsel %vm313_vm1, %v1320_v57, %v1324_v48  ;;  %v3520_v42 = vld [vmem:[%s3792_s13 + $0x8] sm:$0xf0] }
 0x12b   : > { %v1086_v30 = vadd.f32 %v1028_v5, %v834_v51  ;;  %v1402_v45 = vpop.f32.mrf.mxu0 }
 0x12d   : > { %v4199_v24 = vadd.f32 %v1400_v36, %v1086_v30  ;;  %v2033_v36 = vshrl.u32 %v4177_v26, 16 }
 0x12f   : > { %v2035_v23 = vor.u32 %v2033_v36, %v2031_v40 }
 0x130   : > { %v778_v58 = vpop.f32.mrf.mxu2 }
 0x131   : > { %v835_v5 = vadd.f32 %v778_v58, %v619_v22  ;;  %v621_v8 = vpop.f32.mrf.mxu1  ;;  %v3695_v58 = vmov 0  }
 0x132   : > { %v622_v51 = vadd.f32 %v621_v8, %v4024_v7  ;;  %v4223_v14 = vpop.f32.mrf.mxu3  ;;  %3593 = vset.pattern.permute.xlu0 %v3695_v58  ;;  %v2476_v7 = vld [vmem:[%s4721_s2] sm:$0xff]  ;;  %3594 = vset.pattern.permute.xlu1 %v3695_v58 }
 0x133   : > { %v1087_v56 = vadd.f32 %v1030_v18, %v835_v5  ;;  %v1405_v29 = vpop.f32.mrf.mxu0  ;;  %v3524_v18 = vld [vmem:[%s3792_s13 + $0x10] sm:$0xf0]  ;;  %2506 = vperm.xlu0 %3593, %v2476_v7   ;;  %3595 = vset.pattern.permute.xlu2 %v3695_v58 }
 0x134   : > { %3040 = vmatmul.msk.bf16.gmra.mxu1 %vm430_vm2, %v3831_v32  ;;  %v3522_v32 = vor.u32 %v3521_v31, %v3520_v42  ;;  %v3526_v40 = vor.u32 %v3525_v63, %v3524_v18  ;;  %v3407_v42 = vld [vmem:[%s3792_s13 + $0x10] sm:$0xff] }
 0x135   : > { %3055 = vmatmul.msk.bf16.gmra.mxu2 %vm430_vm2, %v701_v54  ;;  %v4215_v46 = vadd.f32 %v1402_v45, %v1087_v56  ;;  %v2040_v45 = vsel %vm313_vm1, %v2035_v23, %v2039_v16  ;;  %v1485_v54 = vrot.slane %v3934_v62, 1  ;;  %v2296_v56 = vrot.slane %v4177_v26, 1 }
 0x136   : > { %3193 = vmatmul.msk.bf16.gmra.mxu0 %vm430_vm2, %v1325_v0  ;;  %v1484_v8 = vrot.slane %v3522_v32, 1  ;;  %v2295_v61 = vrot.slane %v3526_v40, 1 }
 0x137   : > { %3334 = vmatmul.msk.bf16.gmra.mxu3 %vm430_vm2, %v2040_v45 }
 0x138   : > { %v781_v30 = vpop.f32.mrf.mxu2 }
 0x139   : > { %v836_v15 = vadd.f32 %v781_v30, %v622_v51  ;;  %v623_v22 = vpop.f32.mrf.mxu1  ;;  %v1486_v30 = vsel %vm672_vm3, %v1484_v8, %v1485_v54 }
 0x13a   : > { %v624_v36 = vadd.f32 %v623_v22, %v4042_v25  ;;  %v1043_v23 = vpop.f32.mrf.mxu3  ;;  %v2477_v25 = vld [vmem:[%s4721_s2 + $0x8] sm:$0xff] }
 0x13b   : > { %v1088_v57 = vadd.f32 %v4179_v52, %v836_v15  ;;  %v1407_v48 = vpop.f32.mrf.mxu0  ;;  %v4235_v52 = vld [vmem:[%s3792_s13 + $0x28] sm:$0xff]  ;;  %v2297_v15 = vsel %vm672_vm3, %v2295_v61, %v2296_v56  ;;  %2511 = vperm.xlu0 %3593, %v2477_v25   ;;  %v4264_v61 = vld [vmem:[%s3792_s13 + $0x30] sm:$0xff] }
 0x13c   : > { %v2045_v18 = vshll.u32 %v4235_v52, 16 }
 0x13d   : > { %v4231_v5 = vadd.f32 %v1405_v29, %v1088_v57  ;;  %v2041_v29 = vshrl.u32 %v4203_v38, 16 }
 0x13e   : > { %v2047_v32 = vrot.slane %v2045_v18, 1 }
 0x13f   : > { %v2043_v22 = vor.u32 %v2041_v29, %v2039_v16 }
 0x140   : > { %v783_v0 = vpop.f32.mrf.mxu2 }
 0x141   : > { %v837_v51 = vadd.f32 %v783_v0, %v624_v36  ;;  %v626_v31 = vpop.f32.mrf.mxu1  ;;  %v2048_v7 = vsel %vm313_vm1, %v2043_v22, %v2047_v32 }
 0x142   : > { %v1045_v57 = vpop.f32.mrf.mxu3 }
 0x143   : > { %v1089_v62 = vadd.f32 %v4194_v50, %v837_v51  ;;  %v1410_v63 = vpop.f32.mrf.mxu0  ;;  %v627_v50 = vadd.f32 %v626_v31, %v4054_v35  ;;  %v1487_v35 = vrot.slane %v3947_v17, 1  ;;  %v2298_v51 = vrot.slane %v4203_v38, 1 }
 0x144   : > { %3195 = vmatmul.msk.bf16.vlgmr.msra.gmra.mxu1 %vm430_vm2, %v1486_v30  ;;  %v3408_v30 = vld [vmem:[%s3792_s13 + $0x18] sm:$0xff] }
 0x145   : > { %3266 = vmatmul.msk.bf16.vlgmr.msra.gmra.mxu2 %vm430_vm2, %v3407_v42  ;;  %v4250_v26 = vadd.f32 %v1407_v48, %v1089_v62  ;;  %v2478_v48 = vld [vmem:[%s4721_s2 + $0x10] sm:$0xff]  ;;  %v1488_v18 = vsel %vm672_vm3, %v1485_v54, %v1487_v35  ;;  %v2049_v62 = vshrl.u32 %v4235_v52, 16  ;;  %v2299_v25 = vsel %vm672_vm3, %v2296_v56, %v2298_v51 }
 0x146   : > { %3348 = vmatmul.msk.bf16.vlgmr.msra.gmra.mxu0 %vm430_vm2, %v2297_v15  ;;  %2516 = vperm.xlu1 %3594, %v2478_v48  }
 0x147   : > { %3335 = vmatmul.msk.bf16.gmra.mxu3 %vm430_vm2, %v2048_v7  ;;  %v2051_v54 = vor.u32 %v2049_v62, %v2047_v32  ;;  %v2057_v62 = vshrl.u32 %v4264_v61, 16 }
 0x148   : > { %v786_v45 = vpop.f32.mrf.mxu2 }
 0x149   : > { %v838_v40 = vadd.f32 %v786_v45, %v627_v50  ;;  %v628_v58 = vpop.f32.mrf.mxu1 }
 0x14a   : > { %v629_v0 = vadd.f32 %v628_v58, %v4072_v47  ;;  %v2479_v47 = vld [vmem:[%s4721_s2 + $0x18] sm:$0xff] }
 0x14b   : > { %v1090_v8 = vadd.f32 %v4206_v13, %v838_v40  ;;  %v1412_v36 = vpop.f32.mrf.mxu0  ;;  %v1048_v13 = vpop.f32.mrf.mxu3 }
 0x14d   : > { %v4260_v16 = vadd.f32 %v1410_v63, %v1090_v8  ;;  %v2053_v63 = vshll.u32 %v4264_v61, 16 }
 0x14e   : > { %2521 = vperm.xlu1 %3594, %v2479_v47  }
 0x14f   : > { %v2055_v22 = vrot.slane %v2053_v63, 1 }
 0x150   : > { %v788_v42 = vpop.f32.mrf.mxu2 }
 0x151   : > { %v839_v31 = vadd.f32 %v788_v42, %v629_v0  ;;  %v631_v29 = vpop.f32.mrf.mxu1  ;;  %v2056_v58 = vsel %vm313_vm1, %v2051_v54, %v2055_v22  ;;  %v4289_v0 = vld [vmem:[%s3792_s13 + $0x38] sm:$0xff] }
 0x152   : > { %v2061_v63 = vshll.u32 %v4289_v0, 16 }
 0x153   : > { %v1091_v15 = vadd.f32 %v4223_v14, %v839_v31  ;;  %v1415_v17 = vpop.f32.mrf.mxu0  ;;  %v632_v14 = vadd.f32 %v631_v29, %v4082_v55  ;;  %v1050_v56 = vpop.f32.mrf.mxu3  ;;  %v2300_v55 = vrot.slane %v4235_v52, 1  ;;  %v3409_v29 = vld [vmem:[%s3792_s13 + $0x20] sm:$0xff]  ;;  %v2059_v52 = vor.u32 %v2057_v62, %v2055_v22 }
 0x154   : > { %3196 = vmatmul.msk.bf16.gmra.mxu1 %vm430_vm2, %v1488_v18 }
 0x155   : > { %3267 = vmatmul.msk.bf16.gmra.mxu2 %vm430_vm2, %v3408_v30  ;;  %v4279_v38 = vadd.f32 %v1412_v36, %v1091_v15  ;;  %v1489_v36 = vrot.slane %v3961_v27, 1  ;;  %v2301_v27 = vsel %vm672_vm3, %v2298_v51, %v2300_v55 }
 0x156   : > { %3349 = vmatmul.msk.bf16.gmra.mxu0 %vm430_vm2, %v2299_v25  ;;  %v2063_v25 = vrot.slane %v2061_v63, 1 }
 0x157   : > { %3336 = vmatmul.msk.bf16.gmra.mxu3 %vm430_vm2, %v2056_v58  ;;  %v4313_v58 = vld [vmem:[%s3792_s13 + $0x40] sm:$0xff] }
 0x158   : > { %v791_v50 = vpop.f32.mrf.mxu2  ;;  %v2064_v51 = vsel %vm313_vm1, %v2059_v52, %v2063_v25  ;;  %v2069_v62 = vshll.u32 %v4313_v58, 16 }
 0x159   : > { %v840_v45 = vadd.f32 %v791_v50, %v632_v14  ;;  %v633_v40 = vpop.f32.mrf.mxu1 }
 0x15a   : > { %v634_v32 = vadd.f32 %v633_v40, %v4098_v2  ;;  %v2482_v40 = vld [vmem:[%s4721_s2 + $0x30] sm:$0xff] }
 0x15b   : > { %v1092_v7 = vadd.f32 %v1043_v23, %v840_v45  ;;  %v1417_v8 = vpop.f32.mrf.mxu0  ;;  %v1053_v31 = vpop.f32.mrf.mxu3  ;;  %v1490_v23 = vsel %vm672_vm3, %v1487_v35, %v1489_v36  ;;  %2536 = vperm.xlu0 %3593, %v2482_v40  }
 0x15d   : > { %v4285_v48 = vadd.f32 %v1415_v17, %v1092_v7 }
 0x160   : > { %v793_v42 = vpop.f32.mrf.mxu2 }
 0x161   : > { %v841_v30 = vadd.f32 %v793_v42, %v634_v32  ;;  %v636_v18 = vpop.f32.mrf.mxu1 }
 0x162   : > { %v637_v35 = vadd.f32 %v636_v18, %v4009_v60  ;;  %v1491_v60 = vrot.slane %v3975_v39, 1 }
 0x163   : > { %v1093_v15 = vadd.f32 %v1045_v57, %v841_v30  ;;  %v1420_v17 = vpop.f32.mrf.mxu0  ;;  %v1055_v54 = vpop.f32.mrf.mxu3  ;;  %v3410_v30 = vld [vmem:[%s3792_s13 + $0x28] sm:$0xff] }
 0x164   : > { %3197 = vmatmul.msk.bf16.gmra.mxu1 %vm430_vm2, %v1490_v23  ;;  %v1492_v18 = vsel %vm672_vm3, %v1489_v36, %v1491_v60  ;;  %v2065_v23 = vshrl.u32 %v4289_v0, 16 }
 0x165   : > { %3268 = vmatmul.msk.bf16.gmra.mxu2 %vm430_vm2, %v3409_v29  ;;  %v4300_v2 = vadd.f32 %v1417_v8, %v1093_v15  ;;  %v2302_v8 = vrot.slane %v4264_v61, 1  ;;  %v2483_v61 = vld [vmem:[%s4721_s2 + $0x38] sm:$0xff] }
 0x166   : > { %3350 = vmatmul.msk.bf16.gmra.mxu0 %vm430_vm2, %v2301_v27  ;;  %2541 = vperm.xlu1 %3594, %v2483_v61  }
 0x167   : > { %3337 = vmatmul.msk.bf16.gmra.mxu3 %vm430_vm2, %v2064_v51  ;;  %v2303_v39 = vsel %vm672_vm3, %v2300_v55, %v2302_v8  ;;  %v2071_v55 = vrot.slane %v2069_v62, 1 }
 0x168   : > { %v796_v47 = vpop.f32.mrf.mxu2 }
 0x169   : > { %v842_v14 = vadd.f32 %v796_v47, %v637_v35  ;;  %v638_v57 = vpop.f32.mrf.mxu1 }
 0x16a   : > { %v639_v7 = vadd.f32 %v638_v57, %v4020_v3  ;;  %v2480_v3 = vld [vmem:[%s4721_s2 + $0x20] sm:$0xff] }
 0x16b   : > { %v1094_v50 = vadd.f32 %v1048_v13, %v842_v14  ;;  %v1422_v45 = vpop.f32.mrf.mxu0  ;;  %v1058_v13 = vpop.f32.mrf.mxu3  ;;  %2526 = vperm.xlu2 %3595, %v2480_v3  }
 0x16d   : > { %v4309_v22 = vadd.f32 %v1420_v17, %v1094_v50  ;;  %v2481_v50 = vld [vmem:[%s4721_s2 + $0x28] sm:$0xff] }
 0x170   : > { %v798_v32 = vpop.f32.mrf.mxu2 }
 0x171   : > { %v843_v42 = vadd.f32 %v798_v32, %v639_v7  ;;  %v641_v29 = vpop.f32.mrf.mxu1  ;;  %v2304_v7 = vrot.slane %v4289_v0, 1 }
 0x172   : > { %v642_v17 = vadd.f32 %v641_v29, %v4037_v20  ;;  %v1493_v20 = vrot.slane %v3989_v49, 1 }
 0x173   : > { %v1095_v63 = vadd.f32 %v1050_v56, %v843_v42  ;;  %v1425_v15 = vpop.f32.mrf.mxu0  ;;  %v2067_v56 = vor.u32 %v2065_v23, %v2063_v25  ;;  %v1060_v52 = vpop.f32.mrf.mxu3  ;;  %2531 = vperm.xlu2 %3595, %v2481_v50   ;;  %v2073_v23 = vshrl.u32 %v4313_v58, 16  ;;  %v2305_v49 = vsel %vm672_vm3, %v2302_v8, %v2304_v7 }
 0x174   : > { %3198 = vmatmul.msk.bf16.gmra.mxu1 %vm430_vm2, %v1492_v18  ;;  %v1494_v18 = vsel %vm672_vm3, %v1491_v60, %v1493_v20 }
 0x175   : > { %3269 = vmatmul.msk.bf16.gmra.mxu2 %vm430_vm2, %v3410_v30  ;;  %v4330_v36 = vadd.f32 %v1422_v45, %v1095_v63  ;;  %v2072_v14 = vsel %vm313_vm1, %v2067_v56, %v2071_v55  ;;  %v4343_v45 = vld [vmem:[%s3792_s13 + $0x48] sm:$0xff]  ;;  %v3411_v30 = vld [vmem:[%s3792_s13 + $0x30] sm:$0xff]  ;;  %v2075_v60 = vor.u32 %v2073_v23, %v2071_v55 }
 0x176   : > { %3351 = vmatmul.msk.bf16.gmra.mxu0 %vm430_vm2, %v2303_v39  ;;  %v2077_v62 = vshll.u32 %v4343_v45, 16 }
 0x177   : > { %3338 = vmatmul.msk.bf16.gmra.mxu3 %vm430_vm2, %v2072_v14  ;;  %v4370_v14 = vld [vmem:[%s3792_s13 + $0x50] sm:$0xff] }
 0x178   : > { %v801_v27 = vpop.f32.mrf.mxu2  ;;  %v2079_v39 = vrot.slane %v2077_v62, 1 }
 0x179   : > { %v844_v35 = vadd.f32 %v801_v27, %v642_v17  ;;  %v643_v47 = vpop.f32.mrf.mxu1 }
 0x17a   : > { %v644_v40 = vadd.f32 %v643_v47, %v4050_v33  ;;  %v2485_v33 = vld [vmem:[%s4721_s2 + $0x48] sm:$0xff]  ;;  %v2080_v17 = vsel %vm313_vm1, %v2075_v60, %v2079_v39  ;;  %v2486_v47 = vld [vmem:[%s4721_s2 + $0x50] sm:$0xff] }
 0x17b   : > { %v1096_v57 = vadd.f32 %v1053_v31, %v844_v35  ;;  %v1427_v51 = vpop.f32.mrf.mxu0  ;;  %v1063_v31 = vpop.f32.mrf.mxu3  ;;  %2551 = vperm.xlu0 %3593, %v2485_v33   ;;  %2556 = vperm.xlu1 %3594, %v2486_v47  }
 0x17d   : > { %v4339_v25 = vadd.f32 %v1425_v15, %v1096_v57 }
 0x180   : > { %v803_v32 = vpop.f32.mrf.mxu2 }
 0x181   : > { %v845_v42 = vadd.f32 %v803_v32, %v644_v40  ;;  %v646_v29 = vpop.f32.mrf.mxu1  ;;  %v3412_v32 = vld [vmem:[%s3792_s13 + $0x38] sm:$0xff] }
 0x183   : > { %v1097_v63 = vadd.f32 %v1055_v54, %v845_v42  ;;  %v1430_v15 = vpop.f32.mrf.mxu0  ;;  %v647_v54 = vadd.f32 %v646_v29, %v4067_v44  ;;  %v1065_v8 = vpop.f32.mrf.mxu3  ;;  %v1495_v44 = vrot.slane %v4007_v59, 1  ;;  %v2081_v29 = vshrl.u32 %v4343_v45, 16 }
 0x184   : > { %3199 = vmatmul.msk.bf16.gmra.mxu1 %vm430_vm2, %v1494_v18  ;;  %v2085_v18 = vshll.u32 %v4370_v14, 16 }
 0x185   : > { %3270 = vmatmul.msk.bf16.gmra.mxu2 %vm430_vm2, %v3411_v30  ;;  %v4357_v0 = vadd.f32 %v1427_v51, %v1097_v63  ;;  %v2306_v51 = vrot.slane %v4313_v58, 1  ;;  %v1496_v30 = vsel %vm672_vm3, %v1493_v20, %v1495_v44  ;;  %v2083_v20 = vor.u32 %v2081_v29, %v2079_v39 }
 0x186   : > { %3352 = vmatmul.msk.bf16.gmra.mxu0 %vm430_vm2, %v2305_v49  ;;  %v2087_v63 = vrot.slane %v2085_v18, 1 }
 0x187   : > { %3339 = vmatmul.msk.bf16.gmra.mxu3 %vm430_vm2, %v2080_v17  ;;  %v2307_v59 = vsel %vm672_vm3, %v2304_v7, %v2306_v51 }
 0x188   : > { %v806_v3 = vpop.f32.mrf.mxu2  ;;  %v2088_v60 = vsel %vm313_vm1, %v2083_v20, %v2087_v63 }
 0x189   : > { %v846_v61 = vadd.f32 %v806_v3, %v647_v54  ;;  %v648_v56 = vpop.f32.mrf.mxu1 }
 0x18a   : > { %v649_v57 = vadd.f32 %v648_v56, %v4080_v53  ;;  %v2484_v53 = vld [vmem:[%s4721_s2 + $0x40] sm:$0xff]  ;;  %v4397_v56 = vld [vmem:[%s3792_s13 + $0x58] sm:$0xff] }
 0x18b   : > { %v1098_v27 = vadd.f32 %v1058_v13, %v846_v61  ;;  %v1432_v35 = vpop.f32.mrf.mxu0  ;;  %v1068_v13 = vpop.f32.mrf.mxu3  ;;  %2546 = vperm.xlu2 %3595, %v2484_v53   ;;  %v2488_v61 = vld [vmem:[%s4721_s2 + $0x60] sm:$0xff] }
 0x18c   : > { %2566 = vperm.xlu0 %3593, %v2488_v61  }
 0x18d   : > { %v4366_v55 = vadd.f32 %v1430_v15, %v1098_v27  ;;  %v2308_v27 = vrot.slane %v4343_v45, 1 }
 0x18f   : > { %v2309_v29 = vsel %vm672_vm3, %v2306_v51, %v2308_v27 }
 0x190   : > { %v808_v50 = vpop.f32.mrf.mxu2 }
 0x191   : > { %v847_v40 = vadd.f32 %v808_v50, %v649_v57  ;;  %v651_v42 = vpop.f32.mrf.mxu1  ;;  %v3413_v57 = vld [vmem:[%s3792_s13 + $0x40] sm:$0xff] }
 0x193   : > { %v1099_v23 = vadd.f32 %v1060_v52, %v847_v40  ;;  %v1435_v62 = vpop.f32.mrf.mxu0  ;;  %v652_v52 = vadd.f32 %v651_v42, %v4095_v1  ;;  %v1070_v7 = vpop.f32.mrf.mxu3  ;;  %v1497_v1 = vrot.slane %v4035_v19, 1  ;;  %v2093_v42 = vshll.u32 %v4397_v56, 16 }
 0x194   : > { %3200 = vmatmul.msk.bf16.gmra.mxu1 %vm430_vm2, %v1496_v30 }
 0x195   : > { %3271 = vmatmul.msk.bf16.gmra.mxu2 %vm430_vm2, %v3412_v32  ;;  %v4384_v58 = vadd.f32 %v1432_v35, %v1099_v23  ;;  %v1498_v40 = vsel %vm672_vm3, %v1495_v44, %v1497_v1  ;;  %v2089_v32 = vshrl.u32 %v4370_v14, 16  ;;  %v2095_v18 = vrot.slane %v2093_v42, 1 }
 0x196   : > { %3353 = vmatmul.msk.bf16.gmra.mxu0 %vm430_vm2, %v2307_v59 }
 0x197   : > { %3340 = vmatmul.msk.bf16.gmra.mxu3 %vm430_vm2, %v2088_v60  ;;  %v2091_v44 = vor.u32 %v2089_v32, %v2087_v63  ;;  %v2491_v63 = vld [vmem:[%s4721_s2 + $0x78] sm:$0xff]  ;;  %v2310_v60 = vrot.slane %v4370_v14, 1 }
 0x198   : > { %v811_v15 = vpop.f32.mrf.mxu2  ;;  %2581 = vperm.xlu0 %3593, %v2491_v63  }
 0x199   : > { %v848_v49 = vadd.f32 %v811_v15, %v652_v52  ;;  %v653_v33 = vpop.f32.mrf.mxu1  ;;  %v2096_v53 = vsel %vm313_vm1, %v2091_v44, %v2095_v18  ;;  %v2487_v15 = vld [vmem:[%s4721_s2 + $0x58] sm:$0xff]  ;;  %v2311_v32 = vsel %vm672_vm3, %v2308_v27, %v2310_v60  ;;  %v2492_v27 = vld [vmem:[%s4721_s2 + $0x80] sm:$0xff] }
 0x19a   : > { %v654_v17 = vadd.f32 %v653_v33, %v4106_v28  ;;  %v2489_v28 = vld [vmem:[%s4721_s2 + $0x68] sm:$0xff]  ;;  %2561 = vperm.xlu2 %3595, %v2487_v15   ;;  %v4431_v33 = vld [vmem:[%s3792_s13 + $0x60] sm:$0xff]  ;;  %v2312_v15 = vrot.slane %v4397_v56, 1 }
 0x19b   : > { %v1100_v54 = vadd.f32 %v1063_v31, %v848_v49  ;;  %v1437_v3 = vpop.f32.mrf.mxu0  ;;  %v4401_v31 = vpop.f32.mrf.mxu3  ;;  %2571 = vperm.xlu1 %3594, %v2489_v28   ;;  %v1499_v49 = vrot.slane %v4065_v41, 1 }
 0x19d   : > { %v4393_v39 = vadd.f32 %v1435_v62, %v1100_v54 }
 0x1a0   : > { %v813_v35 = vpop.f32.mrf.mxu2 }
 0x1a1   : > { %v849_v47 = vadd.f32 %v813_v35, %v654_v17  ;;  %v656_v50 = vpop.f32.mrf.mxu1  ;;  %v3414_v17 = vld [vmem:[%s3792_s13 + $0x48] sm:$0xff] }
 0x1a3   : > { %v1101_v30 = vadd.f32 %v1065_v8, %v849_v47  ;;  %v1440_v19 = vpop.f32.mrf.mxu0  ;;  %v657_v8 = vadd.f32 %v656_v50, %v4022_v4  ;;  %v4417_v51 = vpop.f32.mrf.mxu3  ;;  %v1500_v47 = vsel %vm672_vm3, %v1497_v1, %v1499_v49  ;;  %v2101_v50 = vshll.u32 %v4431_v33, 16  ;;  %2586 = vperm.xlu1 %3594, %v2492_v27  }
 0x1a4   : > { %3201 = vmatmul.msk.bf16.gmra.mxu1 %vm430_vm2, %v1498_v40 }
 0x1a5   : > { %3272 = vmatmul.msk.bf16.gmra.mxu2 %vm430_vm2, %v3413_v57  ;;  %v4413_v45 = vadd.f32 %v1437_v3, %v1101_v30  ;;  %v2097_v57 = vshrl.u32 %v4397_v56, 16  ;;  %v2103_v42 = vrot.slane %v2101_v50, 1 }
 0x1a6   : > { %3354 = vmatmul.msk.bf16.gmra.mxu0 %vm430_vm2, %v2309_v29 }
 0x1a7   : > { %3341 = vmatmul.msk.bf16.gmra.mxu3 %vm430_vm2, %v2096_v53  ;;  %v2099_v1 = vor.u32 %v2097_v57, %v2095_v18  ;;  %v4466_v53 = vld [vmem:[%s3792_s13 + $0x68] sm:$0xff] }
 0x1a8   : > { %v816_v23 = vpop.f32.mrf.mxu2  ;;  %v2109_v57 = vshll.u32 %v4466_v53, 16 }
 0x1a9   : > { %v850_v62 = vadd.f32 %v816_v23, %v657_v8  ;;  %v658_v59 = vpop.f32.mrf.mxu1  ;;  %v2104_v44 = vsel %vm313_vm1, %v2099_v1, %v2103_v42  ;;  %v2498_v1 = vld [vmem:[%s4721_s2 + $0xb0] sm:$0xff] }
 0x1ab   : > { %v1102_v20 = vadd.f32 %v1068_v13, %v850_v62  ;;  %v1442_v52 = vpop.f32.mrf.mxu0  ;;  %v659_v13 = vadd.f32 %v658_v59, %v4039_v21  ;;  %v4435_v3 = vpop.f32.mrf.mxu3  ;;  %v2494_v21 = vld [vmem:[%s4721_s2 + $0x90] sm:$0xff]  ;;  %v4732_v62 = vld [vmem:[#allocation9_spill] sm:$0xff] }
 0x1ac   : > { %2596 = vperm.xlu0 %3593, %v2494_v21   ;;  %v1501_v59 = vrot.slane %v4732_v62, 1 }
 0x1ad   : > { %v4427_v4 = vadd.f32 %v1440_v19, %v1102_v20  ;;  %v4733_v20 = vld [vmem:[#allocation8_spill] sm:$0xff] }
 0x1b0   : > { %v818_v54 = vpop.f32.mrf.mxu2 }
 0x1b1   : > { %v851_v61 = vadd.f32 %v818_v54, %v659_v13  ;;  %v661_v35 = vpop.f32.mrf.mxu1 }
 0x1b3   : > { %v1103_v40 = vadd.f32 %v1070_v7, %v851_v61  ;;  %v1445_v41 = vpop.f32.mrf.mxu0  ;;  %v662_v7 = vadd.f32 %v661_v35, %v4052_v34  ;;  %v4454_v19 = vpop.f32.mrf.mxu3  ;;  %v2497_v34 = vld [vmem:[%s4721_s2 + $0xa8] sm:$0xff]  ;;  %v3415_v61 = vld [vmem:[%s3792_s13 + $0x50] sm:$0xff]  ;;  %v1502_v35 = vsel %vm672_vm3, %v1499_v49, %v1501_v59 }
 0x1b4   : > { %3202 = vmatmul.msk.bf16.gmra.mxu1 %vm430_vm2, %v1500_v47  ;;  %2611 = vperm.xlu0 %3593, %v2497_v34   ;;  %v2105_v47 = vshrl.u32 %v4431_v33, 16  ;;  %v4506_v34 = vld [vmem:[%s3792_s13 + $0x70] sm:$0xff] }
 0x1b5   : > { %3273 = vmatmul.msk.bf16.gmra.mxu2 %vm430_vm2, %v3414_v17  ;;  %v4447_v14 = vadd.f32 %v1442_v52, %v1103_v40  ;;  %v2313_v40 = vsel %vm672_vm3, %v2310_v60, %v2312_v15  ;;  %v2111_v60 = vrot.slane %v2109_v57, 1  ;;  %v2117_v57 = vshll.u32 %v4506_v34, 16 }
 0x1b6   : > { %3355 = vmatmul.msk.bf16.gmra.mxu0 %vm430_vm2, %v2311_v32  ;;  %v2500_v32 = vld [vmem:[%s4721_s2 + $0xc0] sm:$0xff] }
 0x1b7   : > { %3342 = vmatmul.msk.bf16.gmra.mxu3 %vm430_vm2, %v2104_v44 }
 0x1b8   : > { %v821_v30 = vpop.f32.mrf.mxu2 }
 0x1b9   : > { %v852_v29 = vadd.f32 %v821_v30, %v662_v7  ;;  %v663_v28 = vpop.f32.mrf.mxu1 }
 0x1ba   : > { %v664_v52 = vadd.f32 %v663_v28, %v4733_v20  ;;  %v2507_v28 = vpop.permute.xlu0 %2506  ;;  %v2314_v20 = vrot.slane %v4431_v33, 1 }
 0x1bb   : > { %v1104_v8 = vadd.f32 %v4401_v31, %v852_v29  ;;  %v1447_v18 = vpop.f32.mrf.mxu0  ;;  %v2495_v31 = vld [vmem:[%s4721_s2 + $0x98] sm:$0xff]  ;;  %v4473_v13 = vpop.f32.mrf.mxu3 }
 0x1bc   : > { %2601 = vperm.xlu1 %3594, %v2495_v31   ;;  %2626 = vperm.xlu0 %3593, %v2500_v32  }
 0x1bd   : > { %v4462_v23 = vadd.f32 %v1445_v41, %v1104_v8  ;;  %v2490_v41 = vld [vmem:[%s4721_s2 + $0x70] sm:$0xff] }
 0x1be   : > { %2576 = vperm.xlu2 %3595, %v2490_v41  }
 0x1c0   : > { %v823_v63 = vpop.f32.mrf.mxu2 }
 0x1c1   : > { %v853_v54 = vadd.f32 %v823_v63, %v664_v52  ;;  %v1567_v17 = vpop.f32.mrf.mxu1  ;;  %v2501_v52 = vld [vmem:[%s4721_s2 + $0xc8] sm:$0xff] }
 0x1c2   : > { %v1637_v21 = vadd.f32 %v1567_v17, %v4123_v10  ;;  %v2503_v10 = vld [vmem:[%s4721_s2 + $0xd8] sm:$0xff]  ;;  %v2512_v32 = vpop.permute.xlu0 %2511 }
 0x1c3   : > { %v1105_v50 = vadd.f32 %v4417_v51, %v853_v54  ;;  %v2378_v56 = vpop.f32.mrf.mxu0  ;;  %v2107_v51 = vor.u32 %v2105_v47, %v2103_v42  ;;  %v4496_v27 = vpop.f32.mrf.mxu3  ;;  %v2113_v47 = vshrl.u32 %v4466_v53, 16 }
 0x1c4   : > { %3203 = vmatmul.msk.bf16.gmra.mxu1 %vm430_vm2, %v1502_v35  ;;  %2616 = vperm.xlu1 %3594, %v2498_v1  }
 0x1c5   : > { %3274 = vmatmul.msk.bf16.gmra.mxu2 %vm430_vm2, %v3415_v61  ;;  %v4489_v49 = vadd.f32 %v1447_v18, %v1105_v50  ;;  %v2112_v44 = vsel %vm313_vm1, %v2107_v51, %v2111_v60  ;;  %2641 = vperm.xlu0 %3593, %v2503_v10   ;;  %v1503_v18 = vrot.slane %v4116_v37, 1  ;;  %v3416_v61 = vld [vmem:[%s3792_s13 + $0x58] sm:$0xff]  ;;  %v2115_v51 = vor.u32 %v2113_v47, %v2111_v60  ;;  %v2517_v60 = vpop.permute.xlu1 %2516 }
 0x1c6   : > { %3356 = vmatmul.msk.bf16.gmra.mxu0 %vm430_vm2, %v2313_v40  ;;  %v2315_v40 = vsel %vm672_vm3, %v2312_v15, %v2314_v20  ;;  %v2316_v47 = vrot.slane %v4466_v53, 1 }
 0x1c7   : > { %3343 = vmatmul.msk.bf16.gmra.mxu3 %vm430_vm2, %v2112_v44  ;;  %v1504_v35 = vsel %vm672_vm3, %v1501_v59, %v1503_v18 }
 0x1c8   : > { %v1819_v7 = vpop.f32.mrf.mxu2 }
 0x1c9   : > { %v1889_v30 = vadd.f32 %v1819_v7, %v1637_v21  ;;  %v1569_v29 = vpop.f32.mrf.mxu1  ;;  %v2119_v21 = vrot.slane %v2117_v57, 1 }
 0x1ca   : > { %v1638_v62 = vadd.f32 %v1569_v29, %v4132_v9  ;;  %v2493_v9 = vld [vmem:[%s4721_s2 + $0x88] sm:$0xff] }
 0x1cb   : > { %v2380_v8 = vpop.f32.mrf.mxu0  ;;  %v2261_v42 = vadd.f32 %v4435_v3, %v1889_v30  ;;  %v4513_v54 = vpop.f32.mrf.mxu3  ;;  %2591 = vperm.xlu2 %3595, %v2493_v9   ;;  %v4552_v9 = vld [vmem:[%s3792_s13 + $0x78] sm:$0xff] }
 0x1cc   : > { %2631 = vperm.xlu1 %3594, %v2501_v52  }
 0x1cd   : > { %v2448_v31 = vadd.f32 %v2378_v56, %v2261_v42 }
 0x1cf   : > { %v2644_v41 = vmul.f32 %v2507_v28, %v2448_v31 }
 0x1d0   : > { %v1821_v63 = vpop.f32.mrf.mxu2 }
 0x1d1   : > { %v1890_v3 = vadd.f32 %v1821_v63, %v1638_v62  ;;  %v1572_v17 = vpop.f32.mrf.mxu1  ;;  %v2706_v7 = vmul.f32 %v2644_v41, %v2644_v41  ;;  %v2120_v62 = vsel %vm313_vm1, %v2115_v51, %v2119_v21  ;;  %v2121_v51 = vshrl.u32 %v4506_v34, 16 }
 0x1d2   : > { %v1639_v1 = vadd.f32 %v1572_v17, %v4140_v11 }
 0x1d3   : > { %v2262_v50 = vadd.f32 %v4454_v19, %v1890_v3  ;;  %v2383_v56 = vpop.f32.mrf.mxu0  ;;  %v4536_v29 = vpop.f32.mrf.mxu3  ;;  %v4548_v3 = vld [vmem:[%s3792_s13 + $0x60] sm:$0xff] }
 0x1d4   : > { %3204 = vmatmul.msk.bf16.gmra.mxu1 %vm430_vm2, %v1504_v35 }
 0x1d5   : > { %3275 = vmatmul.msk.bf16.gmra.mxu2 %vm430_vm2, %v3416_v61  ;;  %v2449_v59 = vadd.f32 %v2380_v8, %v2262_v50  ;;  %v2496_v8 = vld [vmem:[%s4721_s2 + $0xa0] sm:$0xff]  ;;  %v1505_v61 = vrot.slane %v4548_v3, 1 }
 0x1d6   : > { %3357 = vmatmul.msk.bf16.gmra.mxu0 %vm430_vm2, %v2315_v40  ;;  %2606 = vperm.xlu2 %3595, %v2496_v8  }
 0x1d7   : > { %v2645_v19 = vmul.f32 %v2512_v32, %v2449_v59  ;;  %3344 = vmatmul.msk.bf16.gmra.mxu3 %vm430_vm2, %v2120_v62  ;;  %v2499_v32 = vld [vmem:[%s4721_s2 + $0xb8] sm:$0xff] }
 0x1d8   : > { %v1824_v30 = vpop.f32.mrf.mxu2 }
 0x1d9   : > { %v2672_v15 = vadd.f32 %v2645_v19, %v2644_v41  ;;  %v2707_v28 = vmul.f32 %v2645_v19, %v2645_v19  ;;  %v3449_v44 = vpack.c.bf16 %v2645_v19, %v2644_v41  ;;  %v1891_v10 = vadd.f32 %v1824_v30, %v1639_v1  ;;  %v1574_v42 = vpop.f32.mrf.mxu1 }
 0x1da   : > { %v1640_v17 = vadd.f32 %v1574_v42, %v4149_v43  ;;  %v1506_v43 = vsel %vm672_vm3, %v1503_v18, %v1505_v61  ;;  %v2125_v1 = vshll.u32 %v4552_v9, 16  ;;  %v2123_v18 = vor.u32 %v2121_v51, %v2119_v21  ;;  %v1945_v42 = vld [vmem:[%s3792_s13 + $0x80] sm:$0x1]  ;;  %v2527_v21 = vpop.permute.xlu2 %2526 }
 0x1db   : > { %v2734_v11 = vadd.f32 %v2707_v28, %v2706_v7  ;;  %3450 = vst [vmem:[%s4542_s14] sm:$0xff] %v3449_v44   ;;  %v2263_v52 = vadd.f32 %v4473_v13, %v1891_v10  ;;  %v2385_v31 = vpop.f32.mrf.mxu0  ;;  %v4556_v50 = vpop.f32.mrf.mxu3  ;;  %v4734_v10 = vld [vmem:[#allocation10_spill] sm:$0xff] }
 0x1dc   : > { %v2522_v28 = vpop.permute.xlu1 %2521  ;;  %v2127_v44 = vrot.slane %v2125_v1, 1 }
 0x1dd   : > { %v2450_v63 = vadd.f32 %v2383_v56, %v2263_v52  ;;  %v3417_v56 = vld [vmem:[%s3792_s13 + $0x60] sm:$0xff] }
 0x1de   : > { %2621 = vperm.xlu2 %3595, %v2499_v32  }
 0x1df   : > { %v2646_v35 = vmul.f32 %v2517_v60, %v2450_v63 }
 0x1e0   : > { %v1826_v57 = vpop.f32.mrf.mxu2 }
 0x1e1   : > { %v2673_v40 = vadd.f32 %v2672_v15, %v2646_v35  ;;  %v2708_v13 = vmul.f32 %v2646_v35, %v2646_v35  ;;  %v1892_v41 = vadd.f32 %v1826_v57, %v1640_v17  ;;  %v1577_v59 = vpop.f32.mrf.mxu1  ;;  %v2317_v15 = vsel %vm672_vm3, %v2314_v20, %v2316_v47 }
 0x1e2   : > { %v1641_v8 = vadd.f32 %v1577_v59, %v4734_v10  ;;  %v2128_v17 = vsel %vm313_vm1, %v2123_v18, %v2127_v44  ;;  %v2005_v57 = vunpack.c.l.b16 %v1945_v42 }
 0x1e3   : > { %v2735_v19 = vadd.f32 %v2734_v11, %v2708_v13  ;;  %v2264_v7 = vadd.f32 %v4496_v27, %v1892_v41  ;;  %v2388_v30 = vpop.f32.mrf.mxu0  ;;  %v4580_v62 = vpop.f32.mrf.mxu3 }
 0x1e4   : > { %3205 = vmatmul.msk.bf16.gmra.mxu1 %vm430_vm2, %v1506_v43  ;;  %v4590_v59 = vpack.c.b16 %v2005_v57, %v2005_v57  ;;  %v4735_v43 = vld [vmem:[#allocation11_spill] sm:$0xff] }
 0x1e5   : > { %3276 = vmatmul.msk.bf16.gmra.mxu2 %vm430_vm2, %v3417_v56  ;;  %v2451_v37 = vadd.f32 %v2385_v31, %v2264_v7  ;;  %v2502_v31 = vld [vmem:[%s4721_s2 + $0xd0] sm:$0xff]  ;;  %v2318_v7 = vrot.slane %v4506_v34, 1 }
 0x1e6   : > { %3358 = vmatmul.msk.bf16.gmra.mxu0 %vm430_vm2, %v2317_v15  ;;  %2636 = vperm.xlu2 %3595, %v2502_v31  }
 0x1e7   : > { %v2647_v27 = vmul.f32 %v2522_v28, %v2451_v37  ;;  %3345 = vmatmul.msk.bf16.gmra.mxu3 %vm430_vm2, %v2128_v17 }
 0x1e8   : > { %v1829_v60 = vpop.f32.mrf.mxu2 }
 0x1e9   : > { %v2674_v33 = vadd.f32 %v2673_v40, %v2647_v27  ;;  %v2709_v20 = vmul.f32 %v2647_v27, %v2647_v27  ;;  %v3454_v11 = vpack.c.bf16 %v2647_v27, %v2646_v35  ;;  %v1893_v52 = vadd.f32 %v1829_v60, %v1641_v8  ;;  %v1579_v63 = vpop.f32.mrf.mxu1  ;;  %v3597_v35 = vld [vmem:[%s3792_s13 + $0x68] sm:$0xff] }
 0x1ea   : > { %v1507_v32 = vrot.slane %v3597_v35, 1  ;;  %v1642_v51 = vadd.f32 %v1579_v63, %v4735_v43  ;;  %v2129_v8 = vshrl.u32 %v4552_v9, 16  ;;  %v2133_v27 = vshll.u32 %v4590_v59, 16  ;;  %v2537_v35 = vpop.permute.xlu0 %2536 }
 0x1eb   : > { %v2736_v13 = vadd.f32 %v2735_v19, %v2709_v20  ;;  %3527 = vst [vmem:[%s4542_s14 + $0x8] sm:$0xff] %v3454_v11   ;;  %v2265_v41 = vadd.f32 %v4513_v54, %v1893_v52  ;;  %v2390_v40 = vpop.f32.mrf.mxu0  ;;  %v4594_v28 = vpop.f32.mrf.mxu3  ;;  %v3418_v54 = vld [vmem:[%s3792_s13 + $0x68] sm:$0xff]  ;;  %v4736_v52 = vld [vmem:[#allocation12_spill] sm:$0xff] }
 0x1ec   : > { %v2532_v20 = vpop.permute.xlu2 %2531  ;;  %v2135_v11 = vrot.slane %v2133_v27, 1  ;;  %v3419_v27 = vld [vmem:[%s3792_s13 + $0x70] sm:$0xff] }
 0x1ed   : > { %v2452_v56 = vadd.f32 %v2388_v30, %v2265_v41  ;;  %v1508_v30 = vsel %vm672_vm3, %v1505_v61, %v1507_v32  ;;  %v2131_v61 = vor.u32 %v2129_v8, %v2127_v44 }
 0x1ef   : > { %v2648_v1 = vmul.f32 %v2527_v21, %v2452_v56  ;;  %v2136_v41 = vsel %vm313_vm1, %v2131_v61, %v2135_v11 }
 0x1f0   : > { %v1831_v15 = vpop.f32.mrf.mxu2 }
 0x1f1   : > { %v2675_v19 = vadd.f32 %v2674_v33, %v2648_v1  ;;  %v2710_v37 = vmul.f32 %v2648_v1, %v2648_v1  ;;  %v1894_v18 = vadd.f32 %v1831_v15, %v1642_v51  ;;  %v1582_v10 = vpop.f32.mrf.mxu1  ;;  %v2319_v33 = vsel %vm672_vm3, %v2316_v47, %v2318_v7  ;;  %v3598_v51 = vld [vmem:[%s3792_s13 + $0x70] sm:$0xff] }
 0x1f2   : > { %v1643_v31 = vadd.f32 %v1582_v10, %v4736_v52  ;;  %v1509_v15 = vrot.slane %v3598_v51, 1 }
 0x1f3   : > { %v2737_v42 = vadd.f32 %v2736_v13, %v2710_v37  ;;  %v2266_v60 = vadd.f32 %v4536_v29, %v1894_v18  ;;  %v2393_v34 = vpop.f32.mrf.mxu0  ;;  %v4610_v21 = vpop.f32.mrf.mxu3 }
 0x1f4   : > { %3206 = vmatmul.msk.bf16.gmra.mxu1 %vm430_vm2, %v1508_v30 }
 0x1f5   : > { %3277 = vmatmul.msk.bf16.gmra.mxu2 %vm430_vm2, %v3418_v54  ;;  %v2453_v3 = vadd.f32 %v2390_v40, %v2266_v60 }
 0x1f6   : > { %3359 = vmatmul.msk.bf16.gmra.mxu0 %vm430_vm2, %v2319_v33 }
 0x1f7   : > { %v2649_v63 = vmul.f32 %v2532_v20, %v2453_v3  ;;  %3346 = vmatmul.msk.bf16.gmra.mxu3 %vm430_vm2, %v2136_v41 }
 0x1f8   : > { %v1834_v29 = vpop.f32.mrf.mxu2 }
 0x1f9   : > { %v2676_v53 = vadd.f32 %v2675_v19, %v2649_v63  ;;  %v2711_v47 = vmul.f32 %v2649_v63, %v2649_v63  ;;  %v3459_v17 = vpack.c.bf16 %v2649_v63, %v2648_v1  ;;  %v1895_v57 = vadd.f32 %v1834_v29, %v1643_v31  ;;  %v1584_v13 = vpop.f32.mrf.mxu1 }
 0x1fa   : > { %v1644_v19 = vadd.f32 %v1584_v13, %v4188_v12  ;;  %v2320_v1 = vrot.slane %v4552_v9, 1  ;;  %v2542_v12 = vpop.permute.xlu1 %2541  ;;  %v1511_v13 = vrot.slane %v4192_v6, 1 }
 0x1fb   : > { %v2738_v56 = vadd.f32 %v2737_v42, %v2711_v47  ;;  %3528 = vst [vmem:[%s4542_s14 + $0x10] sm:$0xff] %v3459_v17   ;;  %v2267_v44 = vadd.f32 %v4556_v50, %v1895_v57  ;;  %v2395_v40 = vpop.f32.mrf.mxu0  ;;  %v4619_v54 = vpop.f32.mrf.mxu3  ;;  %v1510_v42 = vsel %vm672_vm3, %v1507_v32, %v1509_v15 }
 0x1fc   : > { %v2321_v20 = vsel %vm672_vm3, %v2318_v7, %v2320_v1  ;;  %v2547_v17 = vpop.permute.xlu2 %2546 }
 0x1fd   : > { %v2454_v43 = vadd.f32 %v2393_v34, %v2267_v44 }
 0x1ff   : > { %v2650_v37 = vmul.f32 %v2537_v35, %v2454_v43 }
 0x200   : > { %v1836_v18 = vpop.f32.mrf.mxu2 }
 0x201   : > { %v2677_v10 = vadd.f32 %v2676_v53, %v2650_v37  ;;  %v2712_v30 = vmul.f32 %v2650_v37, %v2650_v37  ;;  %v1896_v8 = vadd.f32 %v1836_v18, %v1644_v19  ;;  %v1587_v50 = vpop.f32.mrf.mxu1  ;;  %v3420_v19 = vld [vmem:[%s3792_s13 + $0x78] sm:$0xff]  ;;  %v1512_v18 = vsel %vm672_vm3, %v1509_v15, %v1511_v13  ;;  %s3545_s13 = smul.u32 112, %s3744_s19 }
 0x202   : > { %v1645_v3 = vadd.f32 %v1587_v50, %v4199_v24 }
 0x203   : > { %v2739_v60 = vadd.f32 %v2738_v56, %v2712_v30  ;;  %v2268_v34 = vadd.f32 %v4580_v62, %v1896_v8  ;;  %v2398_v33 = vpop.f32.mrf.mxu0  ;;  %v2218_v32 = vpop.f32.mrf.mxu3  ;;  %v2322_v56 = vrot.slane %v4590_v59, 1  ;;  %s2841_s30 = scalar_lea.hbm %s4722_s3, %s3545_s13 }
 0x204   : > { %3207 = vmatmul.msk.bf16.gmra.mxu1 %vm430_vm2, %v1510_v42  ;;  %s2844_s6 = sshll.u32 %s2841_s30, 4  ;;  %s2845_s6 = int_to_ptr.hbm [resolvable:$true] %s2844_s6 }
 0x205   : > { %3278 = vmatmul.msk.bf16.gmra.mxu2 %vm430_vm2, %v3419_v27  ;;  %v2455_v9 = vadd.f32 %v2395_v40, %v2268_v34  ;;  %v2323_v6 = vsel %vm672_vm3, %v2320_v1, %v2322_v56  ;;  %s3613_s9 = sshra.s32 %s2845_s6, 4  ;;  %s3614_s9 = int_to_ptr.hbm [resolvable:$true] %s3613_s9 }
 0x206   : > { %3360 = vmatmul.msk.bf16.gmra.mxu0 %vm430_vm2, %v2321_v20  ;;  %s3615_s10 = scalar_lea.hbm %s3614_s9, 112  ;;  %p3620_p0 = scmp.lt.s32.totalorder %s3614_s9, %s4722_s3 }
 0x207   : > { %v2651_v61 = vmul.f32 %v2542_v12, %v2455_v9  ;;  %v2557_v9 = vpop.permute.xlu1 %2556  ;;  %p3616_p11 = scmp.ne.s32.totalorder %s3614_s9, %s3615_s10  ;;  %p3621_p1 = scmp.lt.s32.totalorder %s3619_s20, %s3615_s10 }
 0x208   : > { %v1839_v11 = vpop.f32.mrf.mxu2 }
 0x209   : > { %v2678_v52 = vadd.f32 %v2677_v10, %v2651_v61  ;;  %v2713_v31 = vmul.f32 %v2651_v61, %v2651_v61  ;;  %v3464_v62 = vpack.c.bf16 %v2651_v61, %v2650_v37  ;;  %v1897_v63 = vadd.f32 %v1839_v11, %v1645_v3  ;;  %v1589_v29 = vpop.f32.mrf.mxu1  ;;  %p3617_p12 = pnand %p3616_p11, %p3761_p5  ;;  %p3622_p2 = por %p3621_p1, %p3620_p0 }
 0x20a   : > { %v1646_v24 = vadd.f32 %v1589_v29, %v4215_v46  ;;  %v2552_v46 = vpop.permute.xlu0 %2551 }
 0x20b   : > { %v2740_v7 = vadd.f32 %v2739_v60, %v2713_v31  ;;  %3529 = vst [vmem:[%s4542_s14 + $0x18] sm:$0xff] %v3464_v62   ;;  %v2269_v53 = vadd.f32 %v4594_v28, %v1897_v63  ;;  %v2400_v47 = vpop.f32.mrf.mxu0  ;;  %v2221_v40 = vpop.f32.mrf.mxu3  ;;  %p3618_p13 = pneg %p3617_p12 }
 0x20d   : > { %v2456_v57 = vadd.f32 %v2398_v33, %v2269_v53  ;;  %p3623_p3 = pnand %p3622_p2, %p3618_p13 }
 0x20f   : > { %v2652_v41 = vmul.f32 %v2547_v17, %v2456_v57  ;;  %v2562_v17 = vpop.permute.xlu2 %2561 }
 0x210   : > { %v1841_v44 = vpop.f32.mrf.mxu2 }
 0x211   : > { %v2679_v35 = vadd.f32 %v2678_v52, %v2652_v41  ;;  %v2714_v43 = vmul.f32 %v2652_v41, %v2652_v41  ;;  %v1898_v51 = vadd.f32 %v1841_v44, %v1646_v24  ;;  %v1592_v37 = vpop.f32.mrf.mxu1 }
 0x212   : > { %v1647_v8 = vadd.f32 %v1592_v37, %v4231_v5 }
 0x213   : > { %v2741_v28 = vadd.f32 %v2740_v7, %v2714_v43  ;;  %v2270_v10 = vadd.f32 %v4610_v21, %v1898_v51  ;;  %v2403_v30 = vpop.f32.mrf.mxu0  ;;  %v2223_v15 = vpop.f32.mrf.mxu3 }
 0x214   : > { %3208 = vmatmul.msk.bf16.gmra.mxu1 %vm430_vm2, %v1512_v18  ;;  %v2567_v18 = vpop.permute.xlu0 %2566 }
 0x215   : > { %3279 = vmatmul.msk.bf16.gmra.mxu2 %vm430_vm2, %v3420_v19  ;;  %v2457_v59 = vadd.f32 %v2400_v47, %v2270_v10 }
 0x216   : > { %3361 = vmatmul.msk.bf16.gmra.mxu0 %vm430_vm2, %v2323_v6 }
 0x217   : > { %v2653_v27 = vmul.f32 %v2552_v46, %v2457_v59 }
 0x218   : > { %v1844_v50 = vpop.f32.mrf.mxu2 }
 0x219   : > { %v2680_v42 = vadd.f32 %v2679_v35, %v2653_v27  ;;  %v2715_v60 = vmul.f32 %v2653_v27, %v2653_v27  ;;  %v3469_v21 = vpack.c.bf16 %v2653_v27, %v2652_v41  ;;  %v1899_v34 = vadd.f32 %v1844_v50, %v1647_v8  ;;  %v1594_v33 = vpop.f32.mrf.mxu1 }
 0x21a   : > { %v1648_v61 = vadd.f32 %v1594_v33, %v4250_v26 }
 0x21b   : > { %v2742_v1 = vadd.f32 %v2741_v28, %v2715_v60  ;;  %3530 = vst [vmem:[%s4542_s14 + $0x20] sm:$0xff] %v3469_v21   ;;  %v2271_v20 = vadd.f32 %v4619_v54, %v1899_v34  ;;  %v2405_v12 = vpop.f32.mrf.mxu0  ;;  %v2226_v5 = vpop.f32.mrf.mxu3 }
 0x21d   : > { %v2458_v3 = vadd.f32 %v2403_v30, %v2271_v20 }
 0x21f   : > { %v2654_v11 = vmul.f32 %v2557_v9, %v2458_v3 }
 0x220   : > { %v1846_v52 = vpop.f32.mrf.mxu2 }
 0x221   : > { %v2681_v31 = vadd.f32 %v2680_v42, %v2654_v11  ;;  %v2716_v62 = vmul.f32 %v2654_v11, %v2654_v11  ;;  %v1900_v63 = vadd.f32 %v1846_v52, %v1648_v61  ;;  %v1597_v29 = vpop.f32.mrf.mxu1  ;;  %v2572_v42 = vpop.permute.xlu1 %2571 }
 0x222   : > { %v1649_v54 = vadd.f32 %v1597_v29, %v4260_v16  ;;  %v2577_v52 = vpop.permute.xlu2 %2576 }
 0x223   : > { %v2743_v7 = vadd.f32 %v2742_v1, %v2716_v62  ;;  %v2272_v53 = vadd.f32 %v2218_v32, %v1900_v63  ;;  %v2408_v47 = vpop.f32.mrf.mxu0  ;;  %v2228_v43 = vpop.f32.mrf.mxu3 }
 0x225   : > { %v2459_v57 = vadd.f32 %v2405_v12, %v2272_v53 }
 0x227   : > { %v2655_v13 = vmul.f32 %v2562_v17, %v2459_v57 }
 0x228   : > { %v1849_v24 = vpop.f32.mrf.mxu2 }
 0x229   : > { %v2682_v41 = vadd.f32 %v2681_v31, %v2655_v13  ;;  %v2717_v56 = vmul.f32 %v2655_v13, %v2655_v13  ;;  %v3474_v26 = vpack.c.bf16 %v2655_v13, %v2654_v11  ;;  %v1901_v44 = vadd.f32 %v1849_v24, %v1649_v54  ;;  %v1599_v35 = vpop.f32.mrf.mxu1  ;;  %v2582_v24 = vpop.permute.xlu0 %2581 }
 0x22a   : > { %v1650_v32 = vadd.f32 %v1599_v35, %v4279_v38 }
 0x22b   : > { %v2744_v51 = vadd.f32 %v2743_v7, %v2717_v56  ;;  %3531 = vst [vmem:[%s4542_s14 + $0x28] sm:$0xff] %v3474_v26   ;;  %v2273_v19 = vadd.f32 %v2221_v40, %v1901_v44  ;;  %v2410_v37 = vpop.f32.mrf.mxu0  ;;  %v2231_v60 = vpop.f32.mrf.mxu3 }
 0x22d   : > { %v2460_v28 = vadd.f32 %v2408_v47, %v2273_v19 }
 0x22f   : > { %v2656_v10 = vmul.f32 %v2567_v18, %v2460_v28 }
 0x230   : > { %v1851_v30 = vpop.f32.mrf.mxu2 }
 0x231   : > { %v2683_v6 = vadd.f32 %v2682_v41, %v2656_v10  ;;  %v2718_v16 = vmul.f32 %v2656_v10, %v2656_v10  ;;  %v1902_v46 = vadd.f32 %v1851_v30, %v1650_v32  ;;  %v1602_v59 = vpop.f32.mrf.mxu1 }
 0x232   : > { %v1651_v40 = vadd.f32 %v1602_v59, %v4285_v48 }
 0x233   : > { %v2745_v8 = vadd.f32 %v2744_v51, %v2718_v16  ;;  %v2274_v27 = vadd.f32 %v2223_v15, %v1902_v46  ;;  %v2413_v50 = vpop.f32.mrf.mxu0  ;;  %v2233_v15 = vpop.f32.mrf.mxu3 }
 0x235   : > { %v2461_v21 = vadd.f32 %v2410_v37, %v2274_v27 }
 0x237   : > { %v2657_v34 = vmul.f32 %v2572_v42, %v2461_v21 }
 0x238   : > { %v1854_v33 = vpop.f32.mrf.mxu2 }
 0x239   : > { %v2684_v1 = vadd.f32 %v2683_v6, %v2657_v34  ;;  %v2719_v20 = vmul.f32 %v2657_v34, %v2657_v34  ;;  %v3479_v38 = vpack.c.bf16 %v2657_v34, %v2656_v10  ;;  %v1903_v12 = vadd.f32 %v1854_v33, %v1651_v40  ;;  %v1604_v9 = vpop.f32.mrf.mxu1  ;;  %v2587_v10 = vpop.permute.xlu1 %2586 }
 0x23a   : > { %v1652_v62 = vadd.f32 %v1604_v9, %v4300_v2  ;;  %v2592_v40 = vpop.permute.xlu2 %2591 }
 0x23b   : > { %v2746_v3 = vadd.f32 %v2745_v8, %v2719_v20  ;;  %3532 = vst [vmem:[%s4542_s14 + $0x30] sm:$0xff] %v3479_v38   ;;  %v2275_v61 = vadd.f32 %v2226_v5, %v1903_v12  ;;  %v2415_v11 = vpop.f32.mrf.mxu0  ;;  %v2236_v26 = vpop.f32.mrf.mxu3 }
 0x23d   : > { %v2462_v31 = vadd.f32 %v2413_v50, %v2275_v61 }
 0x23f   : > { %v2658_v63 = vmul.f32 %v2577_v52, %v2462_v31  ;;  %v2597_v31 = vpop.permute.xlu0 %2596 }
 0x240   : > { %v1856_v29 = vpop.f32.mrf.mxu2 }
 0x241   : > { %v2685_v7 = vadd.f32 %v2684_v1, %v2658_v63  ;;  %v2720_v48 = vmul.f32 %v2658_v63, %v2658_v63  ;;  %v1904_v53 = vadd.f32 %v1856_v29, %v1652_v62  ;;  %v1607_v47 = vpop.f32.mrf.mxu1 }
 0x242   : > { %v1653_v5 = vadd.f32 %v1607_v47, %v4309_v22 }
 0x243   : > { %v2747_v17 = vadd.f32 %v2746_v3, %v2720_v48  ;;  %v2276_v57 = vadd.f32 %v2228_v43, %v1904_v53  ;;  %v2418_v54 = vpop.f32.mrf.mxu0  ;;  %v2238_v8 = vpop.f32.mrf.mxu3 }
 0x245   : > { %v2463_v13 = vadd.f32 %v2415_v11, %v2276_v57 }
 0x247   : > { %v2659_v41 = vmul.f32 %v2582_v24, %v2463_v13 }
 0x248   : > { %v1859_v56 = vpop.f32.mrf.mxu2 }
 0x249   : > { %v3484_v44 = vpack.c.bf16 %v2659_v41, %v2658_v63  ;;  %v1905_v35 = vadd.f32 %v1859_v56, %v1653_v5  ;;  %v2686_v2 = vadd.f32 %v2685_v7, %v2659_v41  ;;  %v2721_v51 = vmul.f32 %v2659_v41, %v2659_v41  ;;  %v1609_v19 = vpop.f32.mrf.mxu1 }
 0x24a   : > { %v1654_v30 = vadd.f32 %v1609_v19, %v4330_v36 }
 0x24b   : > { %3533 = vst [vmem:[%s4542_s14 + $0x38] sm:$0xff] %v3484_v44   ;;  %v2277_v37 = vadd.f32 %v2231_v60, %v1905_v35  ;;  %v2748_v18 = vadd.f32 %v2747_v17, %v2721_v51  ;;  %v2420_v28 = vpop.f32.mrf.mxu0  ;;  %v2241_v11 = vpop.f32.mrf.mxu3 }
 0x24d   : > { %v2464_v32 = vadd.f32 %v2418_v54, %v2277_v37  ;;  %v2602_v54 = vpop.permute.xlu1 %2601 }
 0x24f   : > { %v2660_v43 = vmul.f32 %v2587_v10, %v2464_v32 }
 0x250   : > { %v1861_v6 = vpop.f32.mrf.mxu2 }
 0x251   : > { %v2687_v16 = vadd.f32 %v2686_v2, %v2660_v43  ;;  %v2722_v46 = vmul.f32 %v2660_v43, %v2660_v43  ;;  %v1906_v22 = vadd.f32 %v1861_v6, %v1654_v30  ;;  %v1612_v59 = vpop.f32.mrf.mxu1 }
 0x252   : > { %v1655_v34 = vadd.f32 %v1612_v59, %v4339_v25 }
 0x253   : > { %v2749_v27 = vadd.f32 %v2748_v18, %v2722_v46  ;;  %v2278_v50 = vadd.f32 %v2233_v15, %v1906_v22  ;;  %v2423_v42 = vpop.f32.mrf.mxu0  ;;  %v2243_v13 = vpop.f32.mrf.mxu3 }
 0x254   : > { %v2607_v18 = vpop.permute.xlu2 %2606 }
 0x255   : > { %v2465_v21 = vadd.f32 %v2420_v28, %v2278_v50 }
 0x257   : > { %v2661_v60 = vmul.f32 %v2592_v40, %v2465_v21 }
 0x258   : > { %v1864_v33 = vpop.f32.mrf.mxu2 }
 0x259   : > { %v2688_v1 = vadd.f32 %v2687_v16, %v2661_v60  ;;  %v2723_v20 = vmul.f32 %v2661_v60, %v2661_v60  ;;  %v3489_v38 = vpack.c.bf16 %v2661_v60, %v2660_v43  ;;  %v1907_v36 = vadd.f32 %v1864_v33, %v1655_v34  ;;  %v1614_v12 = vpop.f32.mrf.mxu1 }
 0x25a   : > { %v1656_v62 = vadd.f32 %v1614_v12, %v4357_v0 }
 0x25b   : > { %v2750_v9 = vadd.f32 %v2749_v27, %v2723_v20  ;;  %3534 = vst [vmem:[%s4542_s14 + $0x40] sm:$0xff] %v3489_v38   ;;  %v2279_v3 = vadd.f32 %v2236_v26, %v1907_v36  ;;  %v2425_v61 = vpop.f32.mrf.mxu0  ;;  %v2246_v43 = vpop.f32.mrf.mxu3 }
 0x25c   : > { %v2612_v27 = vpop.permute.xlu0 %2611 }
 0x25d   : > { %v2466_v52 = vadd.f32 %v2423_v42, %v2279_v3 }
 0x25f   : > { %v2662_v15 = vmul.f32 %v2597_v31, %v2466_v52 }
 0x260   : > { %v1866_v63 = vpop.f32.mrf.mxu2 }
 0x261   : > { %v2689_v29 = vadd.f32 %v2688_v1, %v2662_v15  ;;  %v2724_v7 = vmul.f32 %v2662_v15, %v2662_v15  ;;  %v1908_v25 = vadd.f32 %v1866_v63, %v1656_v62  ;;  %v1617_v48 = vpop.f32.mrf.mxu1 }
 0x262   : > { %v1657_v41 = vadd.f32 %v1617_v48, %v4366_v55 }
 0x263   : > { %v2751_v53 = vadd.f32 %v2750_v9, %v2724_v7  ;;  %v2280_v47 = vadd.f32 %v2238_v8, %v1908_v25  ;;  %v2428_v17 = vpop.f32.mrf.mxu0  ;;  %v2248_v1 = vpop.f32.mrf.mxu3 }
 0x264   : > { %v2617_v9 = vpop.permute.xlu1 %2616  ;;  %v2622_v25 = vpop.permute.xlu2 %2621 }
 0x265   : > { %v2467_v57 = vadd.f32 %v2425_v61, %v2280_v47 }
 0x267   : > { %v2663_v24 = vmul.f32 %v2602_v54, %v2467_v57 }
 0x268   : > { %v1869_v5 = vpop.f32.mrf.mxu2 }
 0x269   : > { %v2690_v56 = vadd.f32 %v2689_v29, %v2663_v24  ;;  %v2725_v26 = vmul.f32 %v2663_v24, %v2663_v24  ;;  %v3494_v44 = vpack.c.bf16 %v2663_v24, %v2662_v15  ;;  %v1909_v0 = vadd.f32 %v1869_v5, %v1657_v41  ;;  %v1619_v35 = vpop.f32.mrf.mxu1 }
 0x26a   : > { %v1658_v32 = vadd.f32 %v1619_v35, %v4384_v58 }
 0x26b   : > { %v2752_v2 = vadd.f32 %v2751_v53, %v2725_v26  ;;  %3535 = vst [vmem:[%s4542_s14 + $0x48] sm:$0xff] %v3494_v44   ;;  %v2281_v51 = vadd.f32 %v2241_v11, %v1909_v0  ;;  %v2430_v19 = vpop.f32.mrf.mxu0  ;;  %v2251_v29 = vpop.f32.mrf.mxu3 }
 0x26c   : > { %v2627_v26 = vpop.permute.xlu0 %2626 }
 0x26d   : > { %v2468_v37 = vadd.f32 %v2428_v17, %v2281_v51 }
 0x26f   : > { %v2664_v28 = vmul.f32 %v2607_v18, %v2468_v37 }
 0x270   : > { %v1871_v10 = vpop.f32.mrf.mxu2 }
 0x271   : > { %v2691_v30 = vadd.f32 %v2690_v56, %v2664_v28  ;;  %v2726_v6 = vmul.f32 %v2664_v28, %v2664_v28  ;;  %v1910_v55 = vadd.f32 %v1871_v10, %v1658_v32  ;;  %v1622_v16 = vpop.f32.mrf.mxu1 }
 0x272   : > { %v1659_v42 = vadd.f32 %v1622_v16, %v4393_v39 }
 0x273   : > { %v2753_v46 = vadd.f32 %v2752_v2, %v2726_v6  ;;  %v2282_v22 = vadd.f32 %v2243_v13, %v1910_v55  ;;  %v2433_v59 = vpop.f32.mrf.mxu0  ;;  %v2253_v44 = vpop.f32.mrf.mxu3 }
 0x275   : > { %v2469_v8 = vadd.f32 %v2430_v19, %v2282_v22 }
 0x277   : > { %v2665_v50 = vmul.f32 %v2612_v27, %v2469_v8 }
 0x278   : > { %v1874_v21 = vpop.f32.mrf.mxu2 }
 0x279   : > { %v2692_v40 = vadd.f32 %v2691_v30, %v2665_v50  ;;  %v2727_v60 = vmul.f32 %v2665_v50, %v2665_v50  ;;  %v3499_v34 = vpack.c.bf16 %v2665_v50, %v2664_v28  ;;  %v1911_v58 = vadd.f32 %v1874_v21, %v1659_v42  ;;  %v1624_v33 = vpop.f32.mrf.mxu1 }
 0x27a   : > { %v1660_v61 = vadd.f32 %v1624_v33, %v4413_v45 }
 0x27b   : > { %v2754_v20 = vadd.f32 %v2753_v46, %v2727_v60  ;;  %3536 = vst [vmem:[%s4542_s14 + $0x50] sm:$0xff] %v3499_v34   ;;  %v2283_v38 = vadd.f32 %v2246_v43, %v1911_v58  ;;  %v2435_v36 = vpop.f32.mrf.mxu0  ;;  %v2632_v43 = vpop.permute.xlu1 %2631 }
 0x27c   : > { %v2256_v55 = vpop.f32.mrf.mxu3 }
 0x27d   : > { %v2470_v12 = vadd.f32 %v2433_v59, %v2283_v38 }
 0x27f   : > { %v2666_v3 = vmul.f32 %v2617_v9, %v2470_v12 }
 0x280   : > { %v1876_v11 = vpop.f32.mrf.mxu2 }
 0x281   : > { %v2693_v52 = vadd.f32 %v2692_v40, %v2666_v3  ;;  %v2728_v31 = vmul.f32 %v2666_v3, %v2666_v3  ;;  %v1912_v39 = vadd.f32 %v1876_v11, %v1660_v61  ;;  %v1627_v15 = vpop.f32.mrf.mxu1  ;;  %v2637_v40 = vpop.permute.xlu2 %2636 }
 0x282   : > { %v1661_v47 = vadd.f32 %v1627_v15, %v4427_v4 }
 0x283   : > { %v2755_v62 = vadd.f32 %v2754_v20, %v2728_v31  ;;  %v2284_v63 = vadd.f32 %v2248_v1, %v1912_v39  ;;  %v2438_v48 = vpop.f32.mrf.mxu0 }
 0x284   : > { %v2258_v20 = vpop.f32.mrf.mxu3 }
 0x285   : > { %v2471_v7 = vadd.f32 %v2435_v36, %v2284_v63 }
 0x287   : > { %v2667_v53 = vmul.f32 %v2622_v25, %v2471_v7 }
 0x288   : > { %v1879_v17 = vpop.f32.mrf.mxu2 }
 0x289   : > { %v2694_v57 = vadd.f32 %v2693_v52, %v2667_v53  ;;  %v2729_v54 = vmul.f32 %v2667_v53, %v2667_v53  ;;  %v3504_v13 = vpack.c.bf16 %v2667_v53, %v2666_v3  ;;  %v1913_v45 = vadd.f32 %v1879_v17, %v1661_v47  ;;  %v1629_v24 = vpop.f32.mrf.mxu1  ;;  %v2642_v3 = vpop.permute.xlu0 %2641 }
 0x28a   : > { %v1662_v35 = vadd.f32 %v1629_v24, %v4447_v14 }
 0x28b   : > { %v2756_v41 = vadd.f32 %v2755_v62, %v2729_v54  ;;  %3537 = vst [vmem:[%s4542_s14 + $0x58] sm:$0xff] %v3504_v13   ;;  %v2285_v5 = vadd.f32 %v2251_v29, %v1913_v45  ;;  %v2440_v2 = vpop.f32.mrf.mxu0 }
 0x28d   : > { %v2472_v56 = vadd.f32 %v2438_v48, %v2285_v5 }
 0x28f   : > { %v2668_v0 = vmul.f32 %v2627_v26, %v2472_v56 }
 0x290   : > { %v1881_v51 = vpop.f32.mrf.mxu2 }
 0x291   : > { %v2695_v19 = vadd.f32 %v2694_v57, %v2668_v0  ;;  %v2730_v37 = vmul.f32 %v2668_v0, %v2668_v0  ;;  %v1914_v4 = vadd.f32 %v1881_v51, %v1662_v35  ;;  %v1632_v18 = vpop.f32.mrf.mxu1 }
 0x292   : > { %v1663_v6 = vadd.f32 %v1632_v18, %v4462_v23 }
 0x293   : > { %v2757_v28 = vadd.f32 %v2756_v41, %v2730_v37  ;;  %v2286_v32 = vadd.f32 %v2253_v44, %v1914_v4  ;;  %v2443_v8 = vpop.f32.mrf.mxu0 }
 0x295   : > { %v2473_v10 = vadd.f32 %v2440_v2, %v2286_v32 }
 0x297   : > { %v2669_v30 = vmul.f32 %v2632_v43, %v2473_v10 }
 0x298   : > { %v1884_v16 = vpop.f32.mrf.mxu2 }
 0x299   : > { %v2696_v46 = vadd.f32 %v2695_v19, %v2669_v30  ;;  %v2731_v22 = vmul.f32 %v2669_v30, %v2669_v30  ;;  %v3509_v14 = vpack.c.bf16 %v2669_v30, %v2668_v0  ;;  %v1915_v59 = vadd.f32 %v1884_v16, %v1663_v6  ;;  %v1634_v42 = vpop.f32.mrf.mxu1 }
 0x29a   : > { %v1664_v34 = vadd.f32 %v1634_v42, %v4489_v49 }
 0x29b   : > { %v2758_v27 = vadd.f32 %v2757_v28, %v2731_v22  ;;  %3538 = vst [vmem:[%s4542_s14 + $0x60] sm:$0xff] %v3509_v14   ;;  %v2287_v50 = vadd.f32 %v2256_v55, %v1915_v59  ;;  %v2445_v12 = vpop.f32.mrf.mxu0 }
 0x29d   : > { %v2474_v21 = vadd.f32 %v2443_v8, %v2287_v50 }
 0x29f   : > { %v2670_v60 = vmul.f32 %v2637_v40, %v2474_v21 }
 0x2a0   : > { %v1886_v23 = vpop.f32.mrf.mxu2 }
 0x2a1   : > { %v2697_v58 = vadd.f32 %v2696_v46, %v2670_v60  ;;  %v2732_v33 = vmul.f32 %v2670_v60, %v2670_v60  ;;  %v1916_v1 = vadd.f32 %v1886_v23, %v1664_v34 }
 0x2a3   : > { %v2759_v38 = vadd.f32 %v2758_v27, %v2732_v33  ;;  %v2288_v36 = vadd.f32 %v2258_v20, %v1916_v1 }
 0x2a5   : > { %v2475_v9 = vadd.f32 %v2445_v12, %v2288_v36 }
 0x2a7   : > { %v2671_v49 = vmul.f32 %v2642_v3, %v2475_v9 }
 0x2a9   : > { %v2698_v61 = vadd.f32 %v2697_v58, %v2671_v49  ;;  %v2733_v11 = vmul.f32 %v2671_v49, %v2671_v49  ;;  %v3514_v52 = vpack.c.bf16 %v2671_v49, %v2670_v60 }
 0x2ab   : > { %v2699_v31 = vrot.slane %v2698_v61, 4  ;;  %v2760_v39 = vadd.f32 %v2759_v38, %v2733_v11  ;;  %3539 = vst [vmem:[%s4542_s14 + $0x68] sm:$0xff] %v3514_v52  }
 0x2ac   : > { %3626 = shalt.err (!%p3623_p3)
}
 0x2ad   : > { %s3696_s14 = smov 64   ;;  %s3697_s27 = smov 4   ;;  %v2700_v15 = vadd.f32 %v2699_v31, %v2698_v61  ;;  %v2761_v62 = vrot.slane %v2760_v39, 4 }
 0x2ae   : > { %3546 = dma.vmem_to_hbm [thread:$0]  (%p3761_p5), %s2843_s5, 1792, %s2845_s6, %s2825_s8, %s3696_s14, %s3696_s14, %s3697_s27  }
 0x2af   : > { %s2958_s13 = sshll.u32 %s4517_s7, 3  ;;  %s3364_s28 = sshll.u32 %s3744_s19, 3  ;;  %v2701_v63 = vrot.slane %v2700_v15, 2  ;;  %v2762_v29 = vadd.f32 %v2761_v62, %v2760_v39 }
 0x2b0   : > { %s2857_s9 = scalar_lea.hbm %s4723_s4, %s3364_s28  ;;  %s201_s10 = scalar_lea.vmem [#allocation4], %s2958_s13 }
 0x2b1   : > { %v2702_v7 = vadd.f32 %v2701_v63, %v2700_v15  ;;  %v2763_v25 = vrot.slane %v2762_v29, 2  ;;  %s2859_s11 = sshll.u32 %s201_s10, 4  ;;  %s2861_s12 = sshll.u32 %s2857_s9, 4  ;;  %s2860_s11 = int_to_ptr.vmem [resolvable:$true] %s2859_s11  ;;  %s2862_s12 = int_to_ptr.hbm [resolvable:$true] %s2861_s12 }
 0x2b2   : > { %s2830_s19 = scalar_lea.sflag [#allocation5], %s4517_s7  ;;  %s3641_s5 = sshra.s32 %s2862_s12, 4  ;;  %s3642_s5 = int_to_ptr.hbm [resolvable:$true] %s3641_s5 }
 0x2b3   : > { %v2703_v48 = vrot.slane %v2702_v7, 1  ;;  %v2764_v53 = vadd.f32 %v2763_v25, %v2762_v29  ;;  %s3643_s6 = scalar_lea.hbm %s3642_s5, 8  ;;  %s3647_s22 = scalar_lea.hbm %s4723_s4, 16 }
 0x2b4   : > { %p3644_p4 = scmp.ne.s32.totalorder %s3642_s5, %s3643_s6  ;;  %p3648_p9 = scmp.lt.s32.totalorder %s3642_s5, %s4723_s4 }
 0x2b5   : > { %v2704_v47 = vadd.f32 %v2703_v48, %v2702_v7  ;;  %v2765_v17 = vrot.slane %v2764_v53, 1  ;;  %p3649_p10 = scmp.lt.s32.totalorder %s3647_s22, %s3643_s6 }
 0x2b6   : > { %p3645_p7 = pnand %p3644_p4, %p3761_p5 }
 0x2b7   : > { %2705 = vst [vmem:[%s201_s10] sm:$0x1] %v2704_v47  ;;  %v2766_v57 = vadd.f32 %v2765_v17, %v2764_v53  ;;  %p3650_p11 = por %p3649_p10, %p3648_p9 }
 0x2b8   : > { %p3646_p8 = pneg %p3645_p7 }
 0x2b9   : > { %2767 = vst [vmem:[%s201_s10 + $0x1] sm:$0x1] %v2766_v57 }
 0x2ba   : > { %p3651_p12 = pnand %p3650_p11, %p3646_p8 }
 0x2bc   : > { %3654 = shalt.err (!%p3651_p12)
}
 0x2bd   : > { %3547 = dma.vmem_to_hbm [thread:$0]  (%p3761_p5), %s2860_s11, 128, %s2862_s12, %s2830_s19  }
 0x2be PF: > { %p3557_p13 = scmp.ge.s32.totalorder %s3693_s18, 2  ;;  %s2873_s7 = sand.u32 1, %s3681_s15  }
 0x2bf   : > { %s2874_s27 = scalar_lea.sflag [#allocation3], %s2873_s7 }
 0x2c0   : > { %p3551_p0 = pnand %p3557_p13, %p3765_p6 }
 0x2c2   : > { %p3552_p1 = pneg %p3551_p0 }
 0x2c4   : > { %3672 = dma.done.wait (%p3552_p1), %s2874_s27, 1792  }
 0x2c5   : > { %3674 = vsyncadd (%p3552_p1), %s2874_s27, 4294965504  ;;  %s2884_s13 = scalar_lea.sflag [#allocation5], %s2873_s7 }
 0x2c6   : > { %3676 = dma.done.wait (%p3552_p1), %s2884_s13, 128  }
 0x2c7   : > { %3678 = vsyncadd (%p3552_p1), %s2884_s13, 4294967168  ;;  %p18_p5 = scmp.ge.s32.totalorder %s3748_s21, 4   ;;  %s4737_s15 = smov %s3685_s16 }
 0x2c8   : > { %s4738_s16 = smov %s3689_s17  ;;  %s4739_s17 = smov %s3759_s24 }
 0x2c9   : > { %s4740_s18 = smov %s3748_s21  ;;  %20 = sbr.rel (!%p18_p5) target bundleno = 5 (0x5), region = 92 }
 0x2ce   :  { %2890 = vsyncpa [#allocation3], 1 }
 0x2cf   :  { %2892 = vsyncpa [#allocation3 + $0x1], 1 }
 0x2d0   :  { %2893 = vsyncpa [#allocation5], 1 }
 0x2d1   :  { %2895 = vsyncpa [#allocation5 + $0x1], 1 }

</bundles_post_ra>
